<compile_context>
chip_gen: v7x
topology: tpu7x:2x2x1
jax: 0.10.0
libtpu: 0.0.40
codegen_flags: <defaults>
</compile_context>

<pallas_src>
import jax
import jax.numpy as jnp
from jax.experimental import pallas as pl
from jax.experimental.pallas import tpu as pltpu


def _elu(x):
    # ELU(alpha=1): x if x > 0 else exp(x) - 1
    return jnp.where(x > 0, x, jnp.exp(jnp.minimum(x, 0.0)) - 1.0)


def _sigmoid(x):
    return 1.0 / (1.0 + jnp.exp(-x))


def _round_up(n, m):
    return -(-n // m) * m


# ----------------------------------------------------------------------------
# Kernel
# ----------------------------------------------------------------------------
def _make_kernel(wl, bl, dims):
    """wl/bl: static layout dicts name -> (row0, nrows, ncols) / (row, width)."""
    N, H, OUT, SLAB = dims
    NH = N * H
    EPS = 1e-5

    def kernel(x_ref, wslab_ref, bslab_ref, out_ref):
        f32 = jnp.float32

        def W(name):                      # static slice of the weight slab
            r0, nr, nc = wl[name]
            return wslab_ref[r0:r0 + nr, 0:nc]

        def B(name):                      # static slice of the bias slab
            r, w = bl[name]
            return bslab_ref[r:r + 1, 0:w]

        def mm(a, name):
            return jnp.dot(a, W(name), preferred_element_type=f32)

        x = x_ref[...].astype(f32)                          # (TB, N)

        # ---- per-variable GRNs (block-diagonal, embedder folded in) --------
        # One fused matmul gives [linear1(emb) | skip(emb)] for all variables.
        ab = mm(x, "WA") + B("bA")                          # (TB, 2*NH)
        h = _elu(ab[:, :NH])
        skip = ab[:, NH:2 * NH]

        o = mm(h, "W2") + B("b2")
        # dropout: identity (eval mode)
        o = o * _sigmoid(mm(o, "Wg") + B("bg"))
        y = o + skip                                        # (TB, NH)

        # Fused N-way LayerNorm (one pass): mu and E[y^2] from two independent
        # matmuls sharing the block-averaging matrix A; var = E[y^2] - mu^2.
        mu = mm(y, "A")                                     # (TB, NH)
        m2 = mm(y * y, "A")                                 # (TB, NH)
        var = jnp.maximum(m2 - mu * mu, 0.0)
        vsel = (y - mu) * jax.lax.rsqrt(var + EPS) * B("gamma") + B("beta")

        # ---- weight GRN on the flattened per-variable outputs --------------
        cd = mm(vsel, "WB") + B("bB")                       # (TB, H + N)
        h2 = _elu(cd[:, :H])
        s2 = cd[:, H:H + N]
        o2 = mm(h2, "wW2") + B("wb2")
        # dropout: identity (eval mode)
        o2 = o2 * _sigmoid(mm(o2, "wWg") + B("wbg"))
        y2 = o2 + s2                                        # (TB, N)
        mu2 = jnp.mean(y2, axis=-1, keepdims=True)
        var2 = jnp.mean((y2 - mu2) ** 2, axis=-1, keepdims=True)
        logits = (y2 - mu2) * jax.lax.rsqrt(var2 + EPS) * B("wgamma") + B("wbeta")

        # softmax over variables
        mmax = jnp.max(logits, axis=-1, keepdims=True)
        e = jnp.exp(logits - mmax)
        w = e / jnp.sum(e, axis=-1, keepdims=True)          # (TB, N)

        # ---- variable-selection weighted sum (packed lanes) ----------------
        w_exp = mm(w, "Emat")                               # (TB, NH)
        weighted = mm(vsel * w_exp, "Smat")                 # (TB, H)

        # ---- MLP + regressor ------------------------------------------------
        h3 = jnp.maximum(mm(weighted, "M1") + B("mb1"), 0.0)
        h3 = jnp.maximum(mm(h3, "M2") + B("mb2"), 0.0)
        h4 = jnp.maximum(mm(h3, "R1") + B("rb1"), 0.0)

        # Lane-dense (TB, SLAB) output slab: [regressor out | vsn weights | 0].
        # Two independent matmuls (pipelined on the MXU) added in the epilogue.
        out_ref[...] = mm(h4, "R2p") + mm(w, "Pw") + B("rb2p")

    return kernel


# ----------------------------------------------------------------------------
# Host-side one-time packing
# ----------------------------------------------------------------------------
def _pack_weight_slab(mats, width):
    layout = {}
    r = 0
    for name, a in mats:
        layout[name] = (r, a.shape[0], a.shape[1])
        r += _round_up(a.shape[0], 8)          # 8-aligned row starts
    rows = max(8, _round_up(r, 8))
    slab = jnp.zeros((rows, width), jnp.float32)
    for name, a in mats:
        r0, nr, nc = layout[name]
        slab = slab.at[r0:r0 + nr, :nc].set(jnp.asarray(a, jnp.float32))
    return slab, layout


def _pack_bias_slab(vecs, width):
    layout = {}
    rows = max(8, _round_up(len(vecs), 8))
    slab = jnp.zeros((rows, width), jnp.float32)
    for i, (name, v) in enumerate(vecs):
        v = jnp.asarray(v, jnp.float32).reshape(-1)
        layout[name] = (i, v.shape[0])
        slab = slab.at[i, :v.shape[0]].set(v)
    return slab, layout


def _pack_model(p, N, E, OUT, SLAB):
    H = N
    f32 = jnp.float32

    def bd(Wn):  # (N, nin, nout) -> block diagonal (N*nin, N*nout)
        Nv, nin, nout = Wn.shape
        t = Wn[:, :, None, :] * jnp.eye(Nv, dtype=Wn.dtype)[:, None, :, None]
        return t.reshape(Nv * nin, Nv * nout)

    def bd_rows(Wvh):  # (N, H) -> (N, N*H), row v lives in cols v*H:(v+1)*H
        Nv, Hh = Wvh.shape
        return (Wvh[:, None, :] * jnp.eye(Nv, dtype=Wvh.dtype)[:, :, None]
                ).reshape(Nv, Nv * Hh)

    # Fold the Linear(1,E) embedders into the per-variable GRN input linears.
    W1x = jnp.einsum("ve,veh->vh", p["emb_w"], p["W1"])
    b1x = jnp.einsum("ve,veh->vh", p["emb_b"], p["W1"]) + p["b1"]
    Wsx = jnp.einsum("ve,veh->vh", p["emb_w"], p["Ws"])
    bsx = jnp.einsum("ve,veh->vh", p["emb_b"], p["Ws"]) + p["bs"]

    # Fused [linear1 | skip] for the per-variable GRNs.
    WA = jnp.concatenate([bd_rows(W1x), bd_rows(Wsx)], axis=1)     # (N, 2*NH)
    bA = jnp.concatenate([b1x.reshape(-1), bsx.reshape(-1)])

    # Per-group averaging matrix for the fused per-variable LayerNorm.
    A = jnp.kron(jnp.eye(N, dtype=f32), jnp.full((H, H), 1.0 / H, f32))

    # Fused [linear1 | skip] for the weight GRN.
    WB = jnp.concatenate([p["wW1"], p["wWs"]], axis=1)             # (NH, H+N)
    bB = jnp.concatenate([p["wb1"].reshape(-1), p["wbs"].reshape(-1)])

    # Expand per-variable weights to packed lanes / reduce packed lanes to H.
    Emat = jnp.kron(jnp.eye(N, dtype=f32), jnp.ones((1, H), f32))
    Smat = jnp.kron(jnp.ones((N, 1), f32), jnp.eye(H, dtype=f32))

    # Regressor output + vsn-weight placement padded into a lane-dense slab.
    R2p = jnp.zeros((p["R2"].shape[0], SLAB), f32).at[:, :OUT].set(p["R2"])
    Pw = jnp.zeros((N, SLAB), f32).at[:, OUT:OUT + N].set(jnp.eye(N, dtype=f32))
    rb2p = jnp.zeros((SLAB,), f32).at[:OUT].set(p["rb2"].reshape(-1))

    mats = [
        ("WA", WA), ("W2", bd(p["W2"])), ("Wg", bd(p["Wg"])), ("A", A),
        ("WB", WB), ("wW2", p["wW2"]), ("wWg", p["wWg"]),
        ("Emat", Emat), ("Smat", Smat),
        ("M1", p["M1"]), ("M2", p["M2"]), ("R1", p["R1"]),
        ("R2p", R2p), ("Pw", Pw),
    ]
    vecs = [
        ("bA", bA), ("b2", p["b2"]), ("bg", p["bg"]),
        ("gamma", p["gamma"]), ("beta", p["beta"]),
        ("bB", bB), ("wb2", p["wb2"]), ("wbg", p["wbg"]),
        ("wgamma", p["wgamma"]), ("wbeta", p["wbeta"]),
        ("mb1", p["mb1"]), ("mb2", p["mb2"]), ("rb1", p["rb1"]),
        ("rb2p", rb2p),
    ]
    wslab, wl = _pack_weight_slab(mats, SLAB)
    bslab, bl = _pack_bias_slab(vecs, SLAB)
    return wslab, wl, bslab, bl


# ----------------------------------------------------------------------------
# Generation-aware batch tiling
# ----------------------------------------------------------------------------
def _tensorcores_per_chip():
    try:
        kind = jax.devices()[0].device_kind.lower()
    except Exception:
        return 1
    # v7x exposes 2 TensorCores per chip to a single Pallas grid.
    return 2 if ("v7" in kind or "7x" in kind) else 1


def _pick_block_b(B, num_cores):
    if B % 8 != 0:
        return B                                  # single full-batch block
    if num_cores <= 1:
        # Single-TC chips (v5e/v6e): the grid is a serial loop -> one big tile
        # (cap at 4096 rows so the default scoped VMEM limit is never an issue).
        cap = 4096
        if B <= cap:
            return B
        for tb in range(cap, 7, -8):
            if B % tb == 0:
                return tb
        return B
    # Dual-TC (v7x): largest tile giving an even block count >= 2.
    cap = min(B // 2, 1024)
    cap -= cap % 8
    for tb in range(cap, 7, -8):
        if B % tb == 0 and (B // tb) % 2 == 0:
            return tb
    return B


# ----------------------------------------------------------------------------
# Forward builder (packs params ONCE, returns a jitted forward)
# ----------------------------------------------------------------------------
def make_forward(params, num_features, embedding_size, output_size, *, block_b=None):
    N, E, OUT = num_features, embedding_size, output_size
    H = N                                        # hidden_dim == num_tabular_features
    SLAB = max(128, pl.cdiv(OUT + N, 128) * 128)

    wslab, wl, bslab, bl = _pack_model(params, N, E, OUT, SLAB)
    kernel = _make_kernel(wl, bl, (N, H, OUT, SLAB))
    num_cores = _tensorcores_per_chip()

    def forward(x_tab):
        B = x_tab.shape[0]
        TB = _pick_block_b(B, num_cores) if block_b is None else block_b
        assert B % TB == 0 and (TB % 8 == 0 or TB == B), (
            "block_b must divide B and be a multiple of 8 (or equal B)")

        in_specs = [
            pl.BlockSpec((TB, N), lambda i: (i, 0)),
            pl.BlockSpec(wslab.shape, lambda i: (0, 0)),
            pl.BlockSpec(bslab.shape, lambda i: (0, 0)),
        ]
        out_specs = pl.BlockSpec((TB, SLAB), lambda i: (i, 0))

        slab = pl.pallas_call(
            kernel,
            grid=(B // TB,),
            in_specs=in_specs,
            out_specs=out_specs,
            out_shape=jax.ShapeDtypeStruct((B, SLAB), jnp.float32),
            compiler_params=pltpu.CompilerParams(
                dimension_semantics=("parallel",)),
        )(x_tab.astype(jnp.float32), wslab, bslab)

        out = slab[:, :OUT]
        vsn_w = slab[:, OUT:OUT + N]
        if OUT == 1:                              # matches torch `.squeeze(-1)`
            out = jnp.squeeze(out, -1)
        return out, vsn_w

    return jax.jit(forward)


# ----------------------------------------------------------------------------
# Synthetic parameters + pure-JAX reference (mirrors the torch module, eval)
# ----------------------------------------------------------------------------
def init_params(key, num_features, embedding_size, output_size):
    N, E, OUT = num_features, embedding_size, output_size
    H = N
    keys = jax.random.split(key, 32)

    def rnd(k, shape):
        return jax.random.normal(k, shape, jnp.float32) * 0.1

    p = {}
    p["emb_w"] = rnd(keys[0], (N, E))
    p["emb_b"] = rnd(keys[1], (N, E))
    p["W1"] = rnd(keys[2], (N, E, H)); p["b1"] = rnd(keys[3], (N, H))
    p["W2"] = rnd(keys[4], (N, H, H)); p["b2"] = rnd(keys[5], (N, H))
    p["Wg"] = rnd(keys[6], (N, H, H)); p["bg"] = rnd(keys[7], (N, H))
    p["Ws"] = rnd(keys[8], (N, E, H)); p["bs"] = rnd(keys[9], (N, H))
    p["gamma"] = jnp.ones((N, H), jnp.float32)
    p["beta"] = jnp.zeros((N, H), jnp.float32)
    p["wW1"] = rnd(keys[10], (N * H, H)); p["wb1"] = rnd(keys[11], (1, H))
    p["wW2"] = rnd(keys[12], (H, N));     p["wb2"] = rnd(keys[13], (1, N))
    p["wWg"] = rnd(keys[14], (N, N));     p["wbg"] = rnd(keys[15], (1, N))
    p["wWs"] = rnd(keys[16], (N * H, N)); p["wbs"] = rnd(keys[17], (1, N))
    p["wgamma"] = jnp.ones((1, N), jnp.float32)
    p["wbeta"] = jnp.zeros((1, N), jnp.float32)
    p["M1"] = rnd(keys[18], (N, 64));  p["mb1"] = rnd(keys[19], (1, 64))
    p["M2"] = rnd(keys[20], (64, 32)); p["mb2"] = rnd(keys[21], (1, 32))
    p["R1"] = rnd(keys[22], (32, 64)); p["rb1"] = rnd(keys[23], (1, 64))
    p["R2"] = rnd(keys[24], (64, OUT)); p["rb2"] = rnd(keys[25], (1, OUT))
    return p


def reference_forward(x_tab, p, output_size):
    B, N = x_tab.shape
    emb = x_tab[:, :, None] * p["emb_w"][None] + p["emb_b"][None]   # (B, N, E)

    def grn(xin, W1, b1, W2, b2, Wg, bg, Ws, bs, gam, bet):
        h = jax.nn.elu(xin @ W1 + b1)
        o = h @ W2 + b2
        o = o * jax.nn.sigmoid(o @ Wg + bg)
        y = o + (xin @ Ws + bs)
        mu = y.mean(-1, keepdims=True)
        var = ((y - mu) ** 2).mean(-1, keepdims=True)
        return (y - mu) / jnp.sqrt(var + 1e-5) * gam + bet

    var_outs = [grn(emb[:, v], p["W1"][v], p["b1"][v], p["W2"][v], p["b2"][v],
                    p["Wg"][v], p["bg"][v], p["Ws"][v], p["bs"][v],
                    p["gamma"][v], p["beta"][v]) for v in range(N)]
    var_outputs = jnp.stack(var_outs, axis=1)                        # (B, N, H)
    flat = var_outputs.reshape(B, -1)
    logits = grn(flat, p["wW1"], p["wb1"][0], p["wW2"], p["wb2"][0],
                 p["wWg"], p["wbg"][0], p["wWs"], p["wbs"][0],
                 p["wgamma"][0], p["wbeta"][0])
    w = jax.nn.softmax(logits, axis=-1)
    weighted = (var_outputs * w[:, :, None]).sum(1)
    h = jax.nn.relu(weighted @ p["M1"] + p["mb1"][0])
    h = jax.nn.relu(h @ p["M2"] + p["mb2"][0])
    h = jax.nn.relu(h @ p["R1"] + p["rb1"][0])
    out = h @ p["R2"] + p["rb2"][0]
    if output_size == 1:
        out = jnp.squeeze(out, -1)
    return out, w


if __name__ == "__main__":
    B = 64                     # batch
    N_FEATURES = 4             # num_tabular_features (also GRN hidden_dim)
    EMB = 32                   # embedding_size
    OUT = 1                    # output_size

    key = jax.random.PRNGKey(0)
    kx, kp = jax.random.split(key)
    x_tab = jax.random.normal(kx, (B, N_FEATURES), jnp.float32)
    params = init_params(kp, N_FEATURES, EMB, OUT)

    # Packing happens ONCE here; `forward` is a jitted closure over the slabs.
    forward = make_forward(params, N_FEATURES, EMB, OUT)

    out, vsn_w = forward(x_tab)
    out = jax.block_until_ready(out)
    vsn_w = jax.block_until_ready(vsn_w)

    ref_out, ref_w = reference_forward(x_tab, params, OUT)
    assert out.shape == (B,) and vsn_w.shape == (B, N_FEATURES)
    assert jnp.allclose(out, ref_out, atol=1e-3, rtol=1e-3)
    assert jnp.allclose(vsn_w, ref_w, atol=1e-3, rtol=1e-3)

    print("KERNEL_OK")
</pallas_src>

<mosaic_0001>
module attributes {stable_mosaic.version = 11 : i64} {
  func.func @kernel(%arg0: i32, %arg1: memref<64x4xf32, #tpu.memory_space<vmem>>, %arg2: memref<288x128xf32, #tpu.memory_space<vmem>>, %arg3: memref<16x128xf32, #tpu.memory_space<vmem>>, %arg4: memref<64x128xf32, #tpu.memory_space<vmem>>) attributes {dimension_semantics = [#tpu.dimension_semantics<parallel>], iteration_bounds = array<i64: 1>, scalar_prefetch = 0 : i64, scratch_operands = 0 : i64, tpu.core_type = #tpu.core_type<tc>, window_params = [{transform_indices = @transform_0, window_bounds = array<i64: 64, 4>}, {pipeline_mode = #tpu.pipeline_mode<synchronous>, transform_indices = @transform_1, window_bounds = array<i64: 288, 128>}, {pipeline_mode = #tpu.pipeline_mode<synchronous>, transform_indices = @transform_2, window_bounds = array<i64: 16, 128>}, {transform_indices = @transform_3, window_bounds = array<i64: 64, 128>}]} {
    %c0 = arith.constant 0 : index
    %c0_0 = arith.constant 0 : index
    %0 = vector.load %arg1[%c0, %c0_0] : memref<64x4xf32, #tpu.memory_space<vmem>>, vector<64x4xf32>
    %c0_1 = arith.constant 0 : index
    %c0_2 = arith.constant 0 : index
    %1 = vector.load %arg2[%c0_1, %c0_2] : memref<288x128xf32, #tpu.memory_space<vmem>>, vector<4x32xf32>
    %cst = arith.constant dense<0.000000e+00> : vector<64x32xf32>
    %2 = tpu.matmul %0, %1, %cst {dimension_numbers = #tpu.dot_dimension_numbers<[1], [0], [0], [1], [0, 0, 1, 1], [], []>} : vector<64x4xf32>, vector<4x32xf32>, vector<64x32xf32> -> vector<64x32xf32>
    %c0_3 = arith.constant 0 : index
    %c0_4 = arith.constant 0 : index
    %3 = vector.load %arg3[%c0_3, %c0_4] : memref<16x128xf32, #tpu.memory_space<vmem>>, vector<1x32xf32>
    %4 = vector.broadcast %3 : vector<1x32xf32> to vector<64x32xf32>
    %5 = arith.addf %2, %4 : vector<64x32xf32>
    %6 = vector.extract_strided_slice %5 {offsets = [0, 0], sizes = [64, 16], strides = [1, 1]} : vector<64x32xf32> to vector<64x16xf32>
    %cst_5 = arith.constant 0.000000e+00 : f32
    %7 = vector.broadcast %cst_5 : f32 to vector<64x16xf32>
    %8 = arith.cmpf ogt, %6, %7 : vector<64x16xf32>
    %cst_6 = arith.constant 0.000000e+00 : f32
    %9 = vector.broadcast %cst_6 : f32 to vector<64x16xf32>
    %10 = arith.minimumf %6, %9 : vector<64x16xf32>
    %11 = math.exp %10 : vector<64x16xf32>
    %cst_7 = arith.constant 1.000000e+00 : f32
    %12 = vector.broadcast %cst_7 : f32 to vector<64x16xf32>
    %13 = arith.subf %11, %12 : vector<64x16xf32>
    %14 = arith.select %8, %6, %13 : vector<64x16xi1>, vector<64x16xf32>
    %15 = vector.extract_strided_slice %5 {offsets = [0, 16], sizes = [64, 16], strides = [1, 1]} : vector<64x32xf32> to vector<64x16xf32>
    %c8 = arith.constant 8 : index
    %c0_8 = arith.constant 0 : index
    %16 = vector.load %arg2[%c8, %c0_8] : memref<288x128xf32, #tpu.memory_space<vmem>>, vector<16x16xf32>
    %cst_9 = arith.constant dense<0.000000e+00> : vector<64x16xf32>
    %17 = tpu.matmul %14, %16, %cst_9 {dimension_numbers = #tpu.dot_dimension_numbers<[1], [0], [0], [1], [0, 0, 1, 1], [], []>} : vector<64x16xf32>, vector<16x16xf32>, vector<64x16xf32> -> vector<64x16xf32>
    %c1 = arith.constant 1 : index
    %c0_10 = arith.constant 0 : index
    %18 = vector.load %arg3[%c1, %c0_10] : memref<16x128xf32, #tpu.memory_space<vmem>>, vector<1x16xf32>
    %19 = vector.broadcast %18 : vector<1x16xf32> to vector<64x16xf32>
    %20 = arith.addf %17, %19 : vector<64x16xf32>
    %c24 = arith.constant 24 : index
    %c0_11 = arith.constant 0 : index
    %21 = vector.load %arg2[%c24, %c0_11] : memref<288x128xf32, #tpu.memory_space<vmem>>, vector<16x16xf32>
    %cst_12 = arith.constant dense<0.000000e+00> : vector<64x16xf32>
    %22 = tpu.matmul %20, %21, %cst_12 {dimension_numbers = #tpu.dot_dimension_numbers<[1], [0], [0], [1], [0, 0, 1, 1], [], []>} : vector<64x16xf32>, vector<16x16xf32>, vector<64x16xf32> -> vector<64x16xf32>
    %c2 = arith.constant 2 : index
    %c0_13 = arith.constant 0 : index
    %23 = vector.load %arg3[%c2, %c0_13] : memref<16x128xf32, #tpu.memory_space<vmem>>, vector<1x16xf32>
    %24 = vector.broadcast %23 : vector<1x16xf32> to vector<64x16xf32>
    %25 = arith.addf %22, %24 : vector<64x16xf32>
    %cst_14 = arith.constant 0.000000e+00 : f32
    %26 = vector.broadcast %cst_14 : f32 to vector<64x16xf32>
    %27 = arith.subf %26, %25 : vector<64x16xf32>
    %28 = math.exp %27 : vector<64x16xf32>
    %cst_15 = arith.constant 1.000000e+00 : f32
    %29 = vector.broadcast %cst_15 : f32 to vector<64x16xf32>
    %30 = arith.addf %29, %28 : vector<64x16xf32>
    %cst_16 = arith.constant 1.000000e+00 : f32
    %31 = vector.broadcast %cst_16 : f32 to vector<64x16xf32>
    %32 = arith.divf %31, %30 : vector<64x16xf32>
    %33 = arith.mulf %20, %32 : vector<64x16xf32>
    %34 = arith.addf %33, %15 : vector<64x16xf32>
    %c40 = arith.constant 40 : index
    %c0_17 = arith.constant 0 : index
    %35 = vector.load %arg2[%c40, %c0_17] : memref<288x128xf32, #tpu.memory_space<vmem>>, vector<16x16xf32>
    %cst_18 = arith.constant dense<0.000000e+00> : vector<64x16xf32>
    %36 = tpu.matmul %34, %35, %cst_18 {dimension_numbers = #tpu.dot_dimension_numbers<[1], [0], [0], [1], [0, 0, 1, 1], [], []>} : vector<64x16xf32>, vector<16x16xf32>, vector<64x16xf32> -> vector<64x16xf32>
    %37 = arith.mulf %34, %34 : vector<64x16xf32>
    %c40_19 = arith.constant 40 : index
    %c0_20 = arith.constant 0 : index
    %38 = vector.load %arg2[%c40_19, %c0_20] : memref<288x128xf32, #tpu.memory_space<vmem>>, vector<16x16xf32>
    %cst_21 = arith.constant dense<0.000000e+00> : vector<64x16xf32>
    %39 = tpu.matmul %37, %38, %cst_21 {dimension_numbers = #tpu.dot_dimension_numbers<[1], [0], [0], [1], [0, 0, 1, 1], [], []>} : vector<64x16xf32>, vector<16x16xf32>, vector<64x16xf32> -> vector<64x16xf32>
    %40 = arith.mulf %36, %36 : vector<64x16xf32>
    %41 = arith.subf %39, %40 : vector<64x16xf32>
    %cst_22 = arith.constant 0.000000e+00 : f32
    %42 = vector.broadcast %cst_22 : f32 to vector<64x16xf32>
    %43 = arith.maximumf %41, %42 : vector<64x16xf32>
    %44 = arith.subf %34, %36 : vector<64x16xf32>
    %cst_23 = arith.constant 9.99999974E-6 : f32
    %45 = vector.broadcast %cst_23 : f32 to vector<64x16xf32>
    %46 = arith.addf %43, %45 : vector<64x16xf32>
    %47 = math.rsqrt %46 : vector<64x16xf32>
    %48 = arith.mulf %44, %47 : vector<64x16xf32>
    %c3 = arith.constant 3 : index
    %c0_24 = arith.constant 0 : index
    %49 = vector.load %arg3[%c3, %c0_24] : memref<16x128xf32, #tpu.memory_space<vmem>>, vector<1x16xf32>
    %50 = vector.broadcast %49 : vector<1x16xf32> to vector<64x16xf32>
    %51 = arith.mulf %48, %50 : vector<64x16xf32>
    %c4 = arith.constant 4 : index
    %c0_25 = arith.constant 0 : index
    %52 = vector.load %arg3[%c4, %c0_25] : memref<16x128xf32, #tpu.memory_space<vmem>>, vector<1x16xf32>
    %53 = vector.broadcast %52 : vector<1x16xf32> to vector<64x16xf32>
    %54 = arith.addf %51, %53 : vector<64x16xf32>
    %c56 = arith.constant 56 : index
    %c0_26 = arith.constant 0 : index
    %55 = vector.load %arg2[%c56, %c0_26] : memref<288x128xf32, #tpu.memory_space<vmem>>, vector<16x8xf32>
    %cst_27 = arith.constant dense<0.000000e+00> : vector<64x8xf32>
    %56 = tpu.matmul %54, %55, %cst_27 {dimension_numbers = #tpu.dot_dimension_numbers<[1], [0], [0], [1], [0, 0, 1, 1], [], []>} : vector<64x16xf32>, vector<16x8xf32>, vector<64x8xf32> -> vector<64x8xf32>
    %c5 = arith.constant 5 : index
    %c0_28 = arith.constant 0 : index
    %57 = vector.load %arg3[%c5, %c0_28] : memref<16x128xf32, #tpu.memory_space<vmem>>, vector<1x8xf32>
    %58 = vector.broadcast %57 : vector<1x8xf32> to vector<64x8xf32>
    %59 = arith.addf %56, %58 : vector<64x8xf32>
    %60 = vector.extract_strided_slice %59 {offsets = [0, 0], sizes = [64, 4], strides = [1, 1]} : vector<64x8xf32> to vector<64x4xf32>
    %cst_29 = arith.constant 0.000000e+00 : f32
    %61 = vector.broadcast %cst_29 : f32 to vector<64x4xf32>
    %62 = arith.cmpf ogt, %60, %61 : vector<64x4xf32>
    %cst_30 = arith.constant 0.000000e+00 : f32
    %63 = vector.broadcast %cst_30 : f32 to vector<64x4xf32>
    %64 = arith.minimumf %60, %63 : vector<64x4xf32>
    %65 = math.exp %64 : vector<64x4xf32>
    %cst_31 = arith.constant 1.000000e+00 : f32
    %66 = vector.broadcast %cst_31 : f32 to vector<64x4xf32>
    %67 = arith.subf %65, %66 : vector<64x4xf32>
    %68 = arith.select %62, %60, %67 : vector<64x4xi1>, vector<64x4xf32>
    %69 = vector.extract_strided_slice %59 {offsets = [0, 4], sizes = [64, 4], strides = [1, 1]} : vector<64x8xf32> to vector<64x4xf32>
    %c72 = arith.constant 72 : index
    %c0_32 = arith.constant 0 : index
    %70 = vector.load %arg2[%c72, %c0_32] : memref<288x128xf32, #tpu.memory_space<vmem>>, vector<4x4xf32>
    %cst_33 = arith.constant dense<0.000000e+00> : vector<64x4xf32>
    %71 = tpu.matmul %68, %70, %cst_33 {dimension_numbers = #tpu.dot_dimension_numbers<[1], [0], [0], [1], [0, 0, 1, 1], [], []>} : vector<64x4xf32>, vector<4x4xf32>, vector<64x4xf32> -> vector<64x4xf32>
    %c6 = arith.constant 6 : index
    %c0_34 = arith.constant 0 : index
    %72 = vector.load %arg3[%c6, %c0_34] : memref<16x128xf32, #tpu.memory_space<vmem>>, vector<1x4xf32>
    %73 = vector.broadcast %72 : vector<1x4xf32> to vector<64x4xf32>
    %74 = arith.addf %71, %73 : vector<64x4xf32>
    %c80 = arith.constant 80 : index
    %c0_35 = arith.constant 0 : index
    %75 = vector.load %arg2[%c80, %c0_35] : memref<288x128xf32, #tpu.memory_space<vmem>>, vector<4x4xf32>
    %cst_36 = arith.constant dense<0.000000e+00> : vector<64x4xf32>
    %76 = tpu.matmul %74, %75, %cst_36 {dimension_numbers = #tpu.dot_dimension_numbers<[1], [0], [0], [1], [0, 0, 1, 1], [], []>} : vector<64x4xf32>, vector<4x4xf32>, vector<64x4xf32> -> vector<64x4xf32>
    %c7 = arith.constant 7 : index
    %c0_37 = arith.constant 0 : index
    %77 = vector.load %arg3[%c7, %c0_37] : memref<16x128xf32, #tpu.memory_space<vmem>>, vector<1x4xf32>
    %78 = vector.broadcast %77 : vector<1x4xf32> to vector<64x4xf32>
    %79 = arith.addf %76, %78 : vector<64x4xf32>
    %cst_38 = arith.constant 0.000000e+00 : f32
    %80 = vector.broadcast %cst_38 : f32 to vector<64x4xf32>
    %81 = arith.subf %80, %79 : vector<64x4xf32>
    %82 = math.exp %81 : vector<64x4xf32>
    %cst_39 = arith.constant 1.000000e+00 : f32
    %83 = vector.broadcast %cst_39 : f32 to vector<64x4xf32>
    %84 = arith.addf %83, %82 : vector<64x4xf32>
    %cst_40 = arith.constant 1.000000e+00 : f32
    %85 = vector.broadcast %cst_40 : f32 to vector<64x4xf32>
    %86 = arith.divf %85, %84 : vector<64x4xf32>
    %87 = arith.mulf %74, %86 : vector<64x4xf32>
    %88 = arith.addf %87, %69 : vector<64x4xf32>
    %cst_41 = arith.constant dense<0.000000e+00> : vector<64xf32>
    %89 = vector.multi_reduction <add>, %88, %cst_41 [1] : vector<64x4xf32> to vector<64xf32>
    %90 = vector.shape_cast %89 : vector<64xf32> to vector<64x1xf32>
    %cst_42 = arith.constant 4.000000e+00 : f32
    %91 = vector.broadcast %cst_42 : f32 to vector<64x1xf32>
    %92 = arith.divf %90, %91 : vector<64x1xf32>
    %93 = vector.broadcast %92 : vector<64x1xf32> to vector<64x4xf32>
    %94 = arith.subf %88, %93 : vector<64x4xf32>
    %95 = arith.mulf %94, %94 : vector<64x4xf32>
    %cst_43 = arith.constant dense<0.000000e+00> : vector<64xf32>
    %96 = vector.multi_reduction <add>, %95, %cst_43 [1] : vector<64x4xf32> to vector<64xf32>
    %97 = vector.shape_cast %96 : vector<64xf32> to vector<64x1xf32>
    %cst_44 = arith.constant 4.000000e+00 : f32
    %98 = vector.broadcast %cst_44 : f32 to vector<64x1xf32>
    %99 = arith.divf %97, %98 : vector<64x1xf32>
    %100 = vector.broadcast %92 : vector<64x1xf32> to vector<64x4xf32>
    %101 = arith.subf %88, %100 : vector<64x4xf32>
    %cst_45 = arith.constant 9.99999974E-6 : f32
    %102 = vector.broadcast %cst_45 : f32 to vector<64x1xf32>
    %103 = arith.addf %99, %102 : vector<64x1xf32>
    %104 = math.rsqrt %103 : vector<64x1xf32>
    %105 = vector.broadcast %104 : vector<64x1xf32> to vector<64x4xf32>
    %106 = arith.mulf %101, %105 : vector<64x4xf32>
    %c8_46 = arith.constant 8 : index
    %c0_47 = arith.constant 0 : index
    %107 = vector.load %arg3[%c8_46, %c0_47] : memref<16x128xf32, #tpu.memory_space<vmem>>, vector<1x4xf32>
    %108 = vector.broadcast %107 : vector<1x4xf32> to vector<64x4xf32>
    %109 = arith.mulf %106, %108 : vector<64x4xf32>
    %c9 = arith.constant 9 : index
    %c0_48 = arith.constant 0 : index
    %110 = vector.load %arg3[%c9, %c0_48] : memref<16x128xf32, #tpu.memory_space<vmem>>, vector<1x4xf32>
    %111 = vector.broadcast %110 : vector<1x4xf32> to vector<64x4xf32>
    %112 = arith.addf %109, %111 : vector<64x4xf32>
    %cst_49 = arith.constant dense<0xFF800000> : vector<64xf32>
    %113 = vector.multi_reduction <maximumf>, %112, %cst_49 [1] : vector<64x4xf32> to vector<64xf32>
    %114 = vector.shape_cast %113 : vector<64xf32> to vector<64x1xf32>
    %115 = vector.broadcast %114 : vector<64x1xf32> to vector<64x4xf32>
    %116 = arith.subf %112, %115 : vector<64x4xf32>
    %117 = math.exp %116 : vector<64x4xf32>
    %cst_50 = arith.constant dense<0.000000e+00> : vector<64xf32>
    %118 = vector.multi_reduction <add>, %117, %cst_50 [1] : vector<64x4xf32> to vector<64xf32>
    %119 = vector.shape_cast %118 : vector<64xf32> to vector<64x1xf32>
    %120 = vector.broadcast %119 : vector<64x1xf32> to vector<64x4xf32>
    %121 = arith.divf %117, %120 : vector<64x4xf32>
    %c88 = arith.constant 88 : index
    %c0_51 = arith.constant 0 : index
    %122 = vector.load %arg2[%c88, %c0_51] : memref<288x128xf32, #tpu.memory_space<vmem>>, vector<4x16xf32>
    %cst_52 = arith.constant dense<0.000000e+00> : vector<64x16xf32>
    %123 = tpu.matmul %121, %122, %cst_52 {dimension_numbers = #tpu.dot_dimension_numbers<[1], [0], [0], [1], [0, 0, 1, 1], [], []>} : vector<64x4xf32>, vector<4x16xf32>, vector<64x16xf32> -> vector<64x16xf32>
    %124 = arith.mulf %54, %123 : vector<64x16xf32>
    %c96 = arith.constant 96 : index
    %c0_53 = arith.constant 0 : index
    %125 = vector.load %arg2[%c96, %c0_53] : memref<288x128xf32, #tpu.memory_space<vmem>>, vector<16x4xf32>
    %cst_54 = arith.constant dense<0.000000e+00> : vector<64x4xf32>
    %126 = tpu.matmul %124, %125, %cst_54 {dimension_numbers = #tpu.dot_dimension_numbers<[1], [0], [0], [1], [0, 0, 1, 1], [], []>} : vector<64x16xf32>, vector<16x4xf32>, vector<64x4xf32> -> vector<64x4xf32>
    %c112 = arith.constant 112 : index
    %c0_55 = arith.constant 0 : index
    %127 = vector.load %arg2[%c112, %c0_55] : memref<288x128xf32, #tpu.memory_space<vmem>>, vector<4x64xf32>
    %cst_56 = arith.constant dense<0.000000e+00> : vector<64x64xf32>
    %128 = tpu.matmul %126, %127, %cst_56 {dimension_numbers = #tpu.dot_dimension_numbers<[1], [0], [0], [1], [0, 0, 1, 1], [], []>} : vector<64x4xf32>, vector<4x64xf32>, vector<64x64xf32> -> vector<64x64xf32>
    %c10 = arith.constant 10 : index
    %c0_57 = arith.constant 0 : index
    %129 = vector.load %arg3[%c10, %c0_57] : memref<16x128xf32, #tpu.memory_space<vmem>>, vector<1x64xf32>
    %130 = vector.broadcast %129 : vector<1x64xf32> to vector<64x64xf32>
    %131 = arith.addf %128, %130 : vector<64x64xf32>
    %cst_58 = arith.constant 0.000000e+00 : f32
    %132 = vector.broadcast %cst_58 : f32 to vector<64x64xf32>
    %133 = arith.maximumf %131, %132 : vector<64x64xf32>
    %c120 = arith.constant 120 : index
    %c0_59 = arith.constant 0 : index
    %134 = vector.load %arg2[%c120, %c0_59] : memref<288x128xf32, #tpu.memory_space<vmem>>, vector<64x32xf32>
    %cst_60 = arith.constant dense<0.000000e+00> : vector<64x32xf32>
    %135 = tpu.matmul %133, %134, %cst_60 {dimension_numbers = #tpu.dot_dimension_numbers<[1], [0], [0], [1], [0, 0, 1, 1], [], []>} : vector<64x64xf32>, vector<64x32xf32>, vector<64x32xf32> -> vector<64x32xf32>
    %c11 = arith.constant 11 : index
    %c0_61 = arith.constant 0 : index
    %136 = vector.load %arg3[%c11, %c0_61] : memref<16x128xf32, #tpu.memory_space<vmem>>, vector<1x32xf32>
    %137 = vector.broadcast %136 : vector<1x32xf32> to vector<64x32xf32>
    %138 = arith.addf %135, %137 : vector<64x32xf32>
    %cst_62 = arith.constant 0.000000e+00 : f32
    %139 = vector.broadcast %cst_62 : f32 to vector<64x32xf32>
    %140 = arith.maximumf %138, %139 : vector<64x32xf32>
    %c184 = arith.constant 184 : index
    %c0_63 = arith.constant 0 : index
    %141 = vector.load %arg2[%c184, %c0_63] : memref<288x128xf32, #tpu.memory_space<vmem>>, vector<32x64xf32>
    %cst_64 = arith.constant dense<0.000000e+00> : vector<64x64xf32>
    %142 = tpu.matmul %140, %141, %cst_64 {dimension_numbers = #tpu.dot_dimension_numbers<[1], [0], [0], [1], [0, 0, 1, 1], [], []>} : vector<64x32xf32>, vector<32x64xf32>, vector<64x64xf32> -> vector<64x64xf32>
    %c12 = arith.constant 12 : index
    %c0_65 = arith.constant 0 : index
    %143 = vector.load %arg3[%c12, %c0_65] : memref<16x128xf32, #tpu.memory_space<vmem>>, vector<1x64xf32>
    %144 = vector.broadcast %143 : vector<1x64xf32> to vector<64x64xf32>
    %145 = arith.addf %142, %144 : vector<64x64xf32>
    %cst_66 = arith.constant 0.000000e+00 : f32
    %146 = vector.broadcast %cst_66 : f32 to vector<64x64xf32>
    %147 = arith.maximumf %145, %146 : vector<64x64xf32>
    %c216 = arith.constant 216 : index
    %c0_67 = arith.constant 0 : index
    %148 = vector.load %arg2[%c216, %c0_67] : memref<288x128xf32, #tpu.memory_space<vmem>>, vector<64x128xf32>
    %cst_68 = arith.constant dense<0.000000e+00> : vector<64x128xf32>
    %149 = tpu.matmul %147, %148, %cst_68 {dimension_numbers = #tpu.dot_dimension_numbers<[1], [0], [0], [1], [0, 0, 1, 1], [], []>} : vector<64x64xf32>, vector<64x128xf32>, vector<64x128xf32> -> vector<64x128xf32>
    %c280 = arith.constant 280 : index
    %c0_69 = arith.constant 0 : index
    %150 = vector.load %arg2[%c280, %c0_69] : memref<288x128xf32, #tpu.memory_space<vmem>>, vector<4x128xf32>
    %cst_70 = arith.constant dense<0.000000e+00> : vector<64x128xf32>
    %151 = tpu.matmul %121, %150, %cst_70 {dimension_numbers = #tpu.dot_dimension_numbers<[1], [0], [0], [1], [0, 0, 1, 1], [], []>} : vector<64x4xf32>, vector<4x128xf32>, vector<64x128xf32> -> vector<64x128xf32>
    %152 = arith.addf %149, %151 : vector<64x128xf32>
    %c13 = arith.constant 13 : index
    %c0_71 = arith.constant 0 : index
    %153 = vector.load %arg3[%c13, %c0_71] : memref<16x128xf32, #tpu.memory_space<vmem>>, vector<1x128xf32>
    %154 = vector.broadcast %153 : vector<1x128xf32> to vector<64x128xf32>
    %155 = arith.addf %152, %154 : vector<64x128xf32>
    %c0_72 = arith.constant 0 : index
    %c0_73 = arith.constant 0 : index
    %156 = vector.load %arg4[%c0_72, %c0_73] : memref<64x128xf32, #tpu.memory_space<vmem>>, vector<64x128xf32>
    tpu.vector_store %arg4[%c0_72, %c0_73], %155 {strides = array<i32>} : memref<64x128xf32, #tpu.memory_space<vmem>>, vector<64x128xf32>,
    return
  }
  func.func @transform_0(%arg0: i32) -> (i32, i32) {
    %c0_i32 = arith.constant 0 : i32
    %c0_i32_0 = arith.constant 0 : i32
    return %arg0, %c0_i32 : i32, i32
  }
  func.func @transform_1(%arg0: i32) -> (i32, i32) {
    %c0_i32 = arith.constant 0 : i32
    %c0_i32_0 = arith.constant 0 : i32
    %c0_i32_1 = arith.constant 0 : i32
    return %c0_i32, %c0_i32_0 : i32, i32
  }
  func.func @transform_2(%arg0: i32) -> (i32, i32) {
    %c0_i32 = arith.constant 0 : i32
    %c0_i32_0 = arith.constant 0 : i32
    %c0_i32_1 = arith.constant 0 : i32
    return %c0_i32, %c0_i32_0 : i32, i32
  }
  func.func @transform_3(%arg0: i32) -> (i32, i32) {
    %c0_i32 = arith.constant 0 : i32
    %c0_i32_0 = arith.constant 0 : i32
    return %arg0, %c0_i32 : i32, i32
  }
}

</mosaic_0001>

<bundles_post_ra>
// kernel: forward.1
= control target key start
LH: loop header
LB: loop body
LE: loop exit
PB: predicated region body
PF: predicated region fallthrough
CT: control target
= control target key end

     0   :  { %8 = vsyncpa [#allocation3], 0  ;;  %s3539_s12 = smov [#allocation2]   ;;  %s4084_s0 = inlined_call_operand.vmem [shape: f32[64,4], index: 0, kind: input, shape index: {}]   ;;  %s4085_s1 = inlined_call_operand.hbm [shape: f32[288,128], index: 1, kind: input, shape index: {}]   ;;  %s4086_s2 = inlined_call_operand.vmem [shape: f32[16,128], index: 2, kind: input, shape index: {}]   ;;  %s4087_s3 = inlined_call_operand.vmem [shape: f32[64,128], index: 3, kind: output, shape index: {}]  }
   0x1   :  { %s16_s13 = sshll.u32 %s3539_s12, 4  ;;  %s3515_s16 = scalar_lea.hbm %s4085_s1, 4608  ;;  %s17_s13 = int_to_ptr.vmem [resolvable:$true] %s16_s13 }
   0x2   :  { %p3516_p0 = scmp.ne.s32.totalorder %s4085_s1, %s3515_s16  ;;  %p3519_p1 = scmp.lt.u32.totalorder %s3515_s16, %s4085_s1 }
   0x4   :  { %p3521_p2 = pnand %p3519_p1, %p3516_p0 }
   0x6   :  { %3524 = shalt.err (!%p3521_p2)
}
   0x7   :  { %s3525_s21 = scalar_lea.vmem %s17_s13, 4608  ;;  %p3530_p4 = scmp.lt.s32.totalorder %s17_s13, %s17_s13 }
   0x8   :  { %p3526_p3 = scmp.ne.s32.totalorder %s17_s13, %s3525_s21  ;;  %p3531_p5 = scmp.lt.s32.totalorder %s3525_s21, %s3525_s21 }
   0xa   :  { %p3532_p6 = por %p3531_p5, %p3530_p4 }
   0xc   :  { %p3533_p7 = pnand %p3532_p6, %p3526_p3 }
   0xe   :  { %3536 = shalt.err (!%p3533_p7)
}
   0xf   :  { %s3540_s22 = smov 128   ;;  %s3541_s23 = smov 8  }
  0x10   :  { %22 = dma.hbm_to_vmem [thread:$0]  %s4085_s1, 4608, %s17_s13, [#allocation3], %s3540_s22, %s3540_s22, %s3541_s23  }
  0x11   :  { %3537 = dma.done.wait [#allocation3], 4608  }
  0x12   :  { %3538 = vsyncadd [#allocation3], 4294962688  ;;  %vm67_vm0 = vcmask 1043456   ;;  %vm42_vm1 = vcmask 31744   ;;  %v36_v0 = vld [vmem:[#allocation2] sm:$0xf] }
  0x13   :  { %v28_v1 = vld [vmem:[%s4084_s0] sm:$0xff]  ;;  %v29_v2 = vld [vmem:[%s4084_s0 + $0x8] sm:$0xff]  ;;  %3020 = vmatprep.subr.msk.mxu0 %vm67_vm0, %v36_v0  ;;  %v30_v3 = vld [vmem:[%s4084_s0 + $0x10] sm:$0xff]  ;;  %vm231_vm2 = vcmask 130048   ;;  %s3543_s26 = smov 124  }
  0x14   :  { %3022 = vmatprep.mubr.msk.f32.mxu0 %vm42_vm1, %v28_v1  ;;  %3021 = vmatpush3.msk.msra.mxu0 %vm67_vm0, %v36_v0  ;;  %v31_v4 = vld [vmem:[%s4084_s0 + $0x18] sm:$0xff]  ;;  %v32_v5 = vld [vmem:[%s4084_s0 + $0x20] sm:$0xff]  ;;  %v33_v6 = vld [vmem:[%s4084_s0 + $0x28] sm:$0xff] }
  0x15   :  { %3023 = vmatmul.mubr.msk.f32.vlgmr.msra.gmra.mrb[0].mxu0 %vm42_vm1, %v29_v2  ;;  %v34_v7 = vld [vmem:[%s4084_s0 + $0x30] sm:$0xff]  ;;  %v35_v8 = vld [vmem:[%s4084_s0 + $0x38] sm:$0xff]  ;;  %v224_v9 = vld [vmem:[#allocation2 + $0x8] sm:$0xff]  ;;  %s3542_s0 = smov 112  }
  0x16   :  { %3025 = vmatprep.mubr.msk.f32.mxu0 %vm42_vm1, %v30_v3  ;;  %v225_v10 = vld [vmem:[#allocation2 + $0x10] sm:$0xff]  ;;  %v2706_v12 = vld [vmem:[%s4086_s2] ss:$0 sm:$0xff]  ;;  %v361_v25 = vld [vmem:[#allocation2 + $0x18] sm:$0xff] }
  0x17   :  { %v3276_v11 = vpack.c.bf16 %v225_v10, %v224_v9  ;;  %v362_v26 = vld [vmem:[#allocation2 + $0x20] sm:$0xff] }
  0x18   :  { %v3280_v28 = vpack.c.bf16 %v362_v26, %v361_v25  ;;  %v593_v25 = vld [vmem:[#allocation2 + $0x28] sm:$0xff]  ;;  %v594_v26 = vld [vmem:[#allocation2 + $0x30] sm:$0xff] }
  0x19   :  { %3026 = vmatmul.mubr.msk.f32.gmra.mrb[2].mxu0 %vm42_vm1, %v31_v4  ;;  %3277 = vmatprep.subr.bf16.mxu0 %v3276_v11 }
  0x1a   :  { %3028 = vmatprep.mubr.msk.f32.mxu0 %vm42_vm1, %v32_v5  ;;  %3340 = vmatprep.subr.bf16.mxu1 %v3276_v11 }
  0x1b   :  { %3279 = vmatpush3.bf16.msra.mxu0 %v3276_v11  ;;  %3341 = vmatpush3.bf16.msra.mxu1 %v3276_v11 }
  0x1c   :  { %3281 = vmatprep.subr.bf16.mxu0 %v3280_v28 }
  0x1d   :  { %3029 = vmatmul.mubr.msk.f32.gmra.mrb[4].mxu0 %vm42_vm1, %v33_v6 }
  0x1e   :  { %3031 = vmatprep.mubr.msk.f32.mxu0 %vm42_vm1, %v34_v7 }
  0x21   :  { %3032 = vmatmul.mubr.msk.f32.gmra.mrb[6].mxu0 %vm42_vm1, %v35_v8  ;;  %v2724_v8 = vld [vmem:[%s4086_s2 + $0x1] ss:$0 sm:$0xff] }
  0xe8   :  { %v3024_v13 = vpop.f32.mrb[0].mxu0 }
  0xe9   :  { %v3613_v14 = vadd.f32 %v3024_v13, %v2706_v12  ;;  %v137_v15 = vpop.f32.mrb[1].mxu0 }
  0xea   :  { %v138_v16 = vadd.f32 %v2706_v12, %v137_v15 }
  0xeb   :  { %v185_v17 = vmin.f32 %v3613_v14, 0.0  ;;  %vm177_vm4 = vcmp.gt.f32.partialorder %v3613_v14, 0.0 }
  0xec   :  { %v184_v18 = vmin.f32 %v138_v16, 0.0  ;;  %v3027_v19 = vpop.f32.mrb[2].mxu0  ;;  %561 = vrot.lane.b32.xlu0 %v138_v16, %s3542_s0  ;;  %vm176_vm3 = vcmp.gt.f32.partialorder %v138_v16, 0.0 }
  0xed   :  { %v194_v20 = vmul.f32 1.442695, %v185_v17  ;;  %v3617_v21 = vadd.f32 %v3027_v19, %v2706_v12  ;;  %v147_v22 = vpop.f32.mrb[3].mxu0 }
  0xee   :  { %v192_v23 = vmul.f32 1.442695, %v184_v18  ;;  %v148_v24 = vadd.f32 %v2706_v12, %v147_v22 }
  0xef   :  { %3355 = vpow2.f32 %v194_v20  ;;  %v187_v27 = vmin.f32 %v3617_v21, 0.0  ;;  %vm179_vm6 = vcmp.gt.f32.partialorder %v3617_v21, 0.0 }
  0xf0   :  { %3357 = vpow2.f32 %v192_v23  ;;  %v186_v29 = vmin.f32 %v148_v24, 0.0  ;;  %v3030_v30 = vpop.f32.mrb[4].mxu0  ;;  %565 = vrot.lane.b32.xlu1 %v148_v24, %s3542_s0  ;;  %563 = vrot.lane.b32.xlu0 %v3613_v14, %s3542_s0  ;;  %vm178_vm5 = vcmp.gt.f32.partialorder %v148_v24, 0.0 }
  0xf1   :  { %v198_v31 = vmul.f32 1.442695, %v187_v27  ;;  %v163_v32 = vadd.f32 %v3030_v30, %v2706_v12  ;;  %v157_v33 = vpop.f32.mrb[5].mxu0  ;;  %v3284_v27 = vpack.c.bf16 %v594_v26, %v593_v25 }
  0xf2   :  { %v196_v34 = vmul.f32 1.442695, %v186_v29  ;;  %v158_v35 = vadd.f32 %v2706_v12, %v157_v33 }
  0xf3   :  { %3359 = vpow2.f32 %v198_v31  ;;  %v189_v36 = vmin.f32 %v163_v32, 0.0  ;;  %vm181_vm8 = vcmp.gt.f32.partialorder %v163_v32, 0.0  ;;  %3285 = vmatprep.subr.bf16.mxu1 %v3284_v27 }
  0xf4   :  { %3361 = vpow2.f32 %v196_v34  ;;  %v188_v37 = vmin.f32 %v158_v35, 0.0  ;;  %v3033_v38 = vpop.f32.mrb[6].mxu0  ;;  %567 = vrot.lane.b32.xlu1 %v3617_v21, %s3542_s0  ;;  %569 = vrot.lane.b32.xlu0 %v158_v35, %s3542_s0  ;;  %vm180_vm7 = vcmp.gt.f32.partialorder %v158_v35, 0.0 }
  0xf5   :  { %v202_v39 = vmul.f32 1.442695, %v189_v36  ;;  %v173_v40 = vadd.f32 %v3033_v38, %v2706_v12  ;;  %v167_v41 = vpop.f32.mrb[7].mxu0 }
  0xf6   :  { %v168_v42 = vadd.f32 %v2706_v12, %v167_v41  ;;  %v200_v43 = vmul.f32 1.442695, %v188_v37 }
  0xf7   :  { %3363 = vpow2.f32 %v202_v39  ;;  %v191_v44 = vmin.f32 %v173_v40, 0.0  ;;  %vm183_vm10 = vcmp.gt.f32.partialorder %v173_v40, 0.0 }
  0xf8   :  { %v190_v45 = vmin.f32 %v168_v42, 0.0  ;;  %571 = vrot.lane.b32.xlu1 %v163_v32, %s3542_s0  ;;  %573 = vrot.lane.b32.xlu0 %v168_v42, %s3542_s0  ;;  %3365 = vpow2.f32 %v200_v43  ;;  %vm182_vm9 = vcmp.gt.f32.partialorder %v168_v42, 0.0 }
  0xf9   :  { %v3356_v46 = vpop.eup %3355  ;;  %v206_v47 = vmul.f32 1.442695, %v191_v44 }
  0xfa   :  { %v3358_v48 = vpop.eup %3357  ;;  %v2717_v49 = vadd.f32 -1.0, %v3356_v46  ;;  %v204_v50 = vmul.f32 1.442695, %v190_v45 }
  0xfb   :  { %3367 = vpow2.f32 %v206_v47  ;;  %v2716_v51 = vadd.f32 -1.0, %v3358_v48 }
  0xfc   :  { %3369 = vpow2.f32 %v204_v50  ;;  %575 = vrot.lane.b32.xlu1 %v173_v40, %s3542_s0  ;;  %v217_v55 = vsel %vm177_vm4, %v3613_v14, %v2717_v49 }
  0xfd   :  { %v3360_v52 = vpop.eup %3359  ;;  %v216_v53 = vsel %vm176_vm3, %v138_v16, %v2716_v51 }
  0xfe   :  { %v3362_v54 = vpop.eup %3361  ;;  %3038 = vmatprep.mubr.msk.f32.mxu0 %vm231_vm2, %v216_v53  ;;  %v2719_v56 = vadd.f32 -1.0, %v3360_v52 }
  0xff   :  { %3039 = vmatmul.mubr.msk.f32.vlgmr.msra.gmra.mrb[8].mxu0 %vm231_vm2, %v217_v55  ;;  %v2718_v57 = vadd.f32 -1.0, %v3362_v54 }
 0x100   :  { %3283 = vmatpush3.bf16.msra.mxu0 %v3280_v28  ;;  %v219_v61 = vsel %vm179_vm6, %v3617_v21, %v2719_v56  ;;  %v2733_v28 = vld [vmem:[%s4086_s2 + $0x2] ss:$0 sm:$0xff] }
 0x101   :  { %v3364_v58 = vpop.eup %3363  ;;  %v218_v59 = vsel %vm178_vm5, %v148_v24, %v2718_v57  ;;  %3289 = vmatprep.subr.bf16.mxu0 %v3284_v27 }
 0x102   :  { %v3366_v60 = vpop.eup %3365  ;;  %3041 = vmatprep.mubr.msk.f32.mxu0 %vm231_vm2, %v218_v59  ;;  %v2721_v62 = vadd.f32 -1.0, %v3364_v58 }
 0x103   :  { %3042 = vmatmul.mubr.msk.f32.gmra.mrb[10].mxu0 %vm231_vm2, %v219_v61  ;;  %v2720_v63 = vadd.f32 -1.0, %v3366_v60 }
 0x104   :  { %v221_v3 = vsel %vm181_vm8, %v163_v32, %v2721_v62 }
 0x105   :  { %v3368_v0 = vpop.eup %3367  ;;  %v220_v1 = vsel %vm180_vm7, %v158_v35, %v2720_v63 }
 0x106   :  { %v3370_v2 = vpop.eup %3369  ;;  %3044 = vmatprep.mubr.msk.f32.mxu1 %vm231_vm2, %v220_v1  ;;  %v2723_v4 = vadd.f32 -1.0, %v3368_v0 }
 0x107   :  { %3045 = vmatmul.mubr.msk.f32.vlgmr.msra.gmra.mrb[0].mxu1 %vm231_vm2, %v221_v3  ;;  %v2722_v5 = vadd.f32 -1.0, %v3370_v2 }
 0x108   :  { %v223_v7 = vsel %vm183_vm10, %v173_v40, %v2723_v4  ;;  %3287 = vmatpush3.bf16.msra.mxu1 %v3284_v27 }
 0x109   :  { %v222_v6 = vsel %vm182_vm9, %v168_v42, %v2722_v5 }
 0x10a   :  { %3047 = vmatprep.mubr.msk.f32.mxu1 %vm231_vm2, %v222_v6 }
 0x10b   :  { %3048 = vmatmul.mubr.msk.f32.gmra.mrb[2].mxu1 %vm231_vm2, %v223_v7 }
 0x15e   :  { %v562_v7 = vpop.permute.xlu0 %561 }
 0x162   :  { %v564_v25 = vpop.permute.xlu0 %563 }
 0x1d2   :  { %v3040_v9 = vpop.f32.mrb[8].mxu0 }
 0x1d3   :  { %v322_v10 = vpop.f32.mrb[9].mxu0  ;;  %v3646_v12 = vadd.f32 %v3040_v9, %v2724_v8 }
 0x1d4   :  { %v3644_v11 = vadd.f32 %v2724_v8, %v322_v10  ;;  %v566_v10 = vpop.permute.xlu1 %565 }
 0x1d6   :  { %v3043_v13 = vpop.f32.mrb[10].mxu0  ;;  %3054 = vmatprep.mubr.msk.f32.mxu0 %vm231_vm2, %v3644_v11 }
 0x1d7   :  { %v332_v14 = vpop.f32.mrb[11].mxu0  ;;  %3055 = vmatmul.mubr.msk.f32.vlgmr.msra.gmra.mrb[12].mxu0 %vm231_vm2, %v3646_v12  ;;  %v3654_v16 = vadd.f32 %v3043_v13, %v2724_v8 }
 0x1d8   :  { %v3652_v15 = vadd.f32 %v2724_v8, %v332_v14  ;;  %3291 = vmatpush3.bf16.msra.mxu0 %v3284_v27 }
 0x1da   :  { %v3046_v17 = vpop.f32.mrb[0].mxu1  ;;  %3057 = vmatprep.mubr.msk.f32.mxu0 %vm231_vm2, %v3652_v15 }
 0x1db   :  { %v342_v18 = vpop.f32.mrb[1].mxu1  ;;  %3058 = vmatmul.mubr.msk.f32.gmra.mrb[14].mxu0 %vm231_vm2, %v3654_v16  ;;  %v3662_v20 = vadd.f32 %v3046_v17, %v2724_v8 }
 0x1dc   :  { %v3660_v19 = vadd.f32 %v2724_v8, %v342_v18 }
 0x1de   :  { %v3049_v21 = vpop.f32.mrb[2].mxu1  ;;  %3060 = vmatprep.mubr.msk.f32.mxu0 %vm231_vm2, %v3660_v19 }
 0x1df   :  { %v352_v22 = vpop.f32.mrb[3].mxu1  ;;  %3061 = vmatmul.mubr.msk.f32.gmra.mrb[16].mxu0 %vm231_vm2, %v3662_v20  ;;  %v3670_v24 = vadd.f32 %v3049_v21, %v2724_v8 }
 0x1e0   :  { %v3668_v23 = vadd.f32 %v2724_v8, %v352_v22 }
 0x1e2   :  { %3063 = vmatprep.mubr.msk.f32.mxu0 %vm231_vm2, %v3668_v23 }
 0x1e3   :  { %3064 = vmatmul.mubr.msk.f32.gmra.mrb[18].mxu0 %vm231_vm2, %v3670_v24 }
 0x2aa   :  { %v3056_v29 = vpop.f32.mrb[12].mxu0 }
 0x2ab   :  { %v464_v30 = vadd.f32 %v3056_v29, %v2733_v28  ;;  %v458_v31 = vpop.f32.mrb[13].mxu0 }
 0x2ac   :  { %v459_v32 = vadd.f32 %v2733_v28, %v458_v31 }
 0x2ad   :  { %v498_v33 = vsub.f32 0.0, %v464_v30  ;;  %v568_v30 = vpop.permute.xlu1 %567 }
 0x2ae   :  { %v497_v34 = vsub.f32 0.0, %v459_v32  ;;  %v3059_v35 = vpop.f32.mrb[14].mxu0 }
 0x2af   :  { %v507_v36 = vmul.f32 1.442695, %v498_v33  ;;  %v474_v37 = vadd.f32 %v3059_v35, %v2733_v28  ;;  %v468_v38 = vpop.f32.mrb[15].mxu0 }
 0x2b0   :  { %v505_v39 = vmul.f32 1.442695, %v497_v34  ;;  %v469_v40 = vadd.f32 %v2733_v28, %v468_v38 }
 0x2b1   :  { %3371 = vpow2.f32 %v507_v36  ;;  %v500_v41 = vsub.f32 0.0, %v474_v37 }
 0x2b2   :  { %3373 = vpow2.f32 %v505_v39  ;;  %v499_v42 = vsub.f32 0.0, %v469_v40  ;;  %v3062_v43 = vpop.f32.mrb[16].mxu0  ;;  %v572_v39 = vpop.permute.xlu1 %571 }
 0x2b3   :  { %v511_v44 = vmul.f32 1.442695, %v500_v41  ;;  %v484_v45 = vadd.f32 %v3062_v43, %v2733_v28  ;;  %v478_v46 = vpop.f32.mrb[17].mxu0  ;;  %v570_v41 = vpop.permute.xlu0 %569 }
 0x2b4   :  { %v509_v47 = vmul.f32 1.442695, %v499_v42  ;;  %v479_v48 = vadd.f32 %v2733_v28, %v478_v46 }
 0x2b5   :  { %3375 = vpow2.f32 %v511_v44  ;;  %v502_v49 = vsub.f32 0.0, %v484_v45 }
 0x2b6   :  { %3377 = vpow2.f32 %v509_v47  ;;  %v501_v50 = vsub.f32 0.0, %v479_v48  ;;  %v3065_v51 = vpop.f32.mrb[18].mxu0  ;;  %v576_v48 = vpop.permute.xlu1 %575 }
 0x2b7   :  { %v515_v52 = vmul.f32 1.442695, %v502_v49  ;;  %v494_v53 = vadd.f32 %v3065_v51, %v2733_v28  ;;  %v488_v54 = vpop.f32.mrb[19].mxu0 }
 0x2b8   :  { %v513_v55 = vmul.f32 1.442695, %v501_v50  ;;  %v489_v56 = vadd.f32 %v2733_v28, %v488_v54  ;;  %v574_v50 = vpop.permute.xlu0 %573  ;;  %v944_v54 = vld [vmem:[#allocation2 + $0x40] sm:$0xff] }
 0x2b9   :  { %3379 = vpow2.f32 %v515_v52  ;;  %v504_v57 = vsub.f32 0.0, %v494_v53 }
 0x2ba   :  { %3381 = vpow2.f32 %v513_v55  ;;  %v503_v58 = vsub.f32 0.0, %v489_v56 }
 0x2bb   :  { %v3372_v59 = vpop.eup %3371  ;;  %v519_v60 = vmul.f32 1.442695, %v504_v57 }
 0x2bc   :  { %v3374_v61 = vpop.eup %3373  ;;  %v522_v62 = vadd.f32 1.0, %v3372_v59  ;;  %v517_v63 = vmul.f32 1.442695, %v503_v58 }
 0x2bd   :  { %v521_v0 = vadd.f32 1.0, %v3374_v61  ;;  %3383 = vpow2.f32 %v519_v60 }
 0x2be   :  { %3385 = vrcp.f32 %v522_v62 }
 0x2bf   :  { %v3376_v1 = vpop.eup %3375  ;;  %3387 = vrcp.f32 %v521_v0 }
 0x2c0   :  { %v3378_v2 = vpop.eup %3377  ;;  %v524_v3 = vadd.f32 1.0, %v3376_v1  ;;  %3389 = vpow2.f32 %v517_v63 }
 0x2c1   :  { %v523_v4 = vadd.f32 1.0, %v3378_v2 }
 0x2c2   :  { %3391 = vrcp.f32 %v524_v3 }
 0x2c3   :  { %v3380_v5 = vpop.eup %3379  ;;  %3393 = vrcp.f32 %v523_v4 }
 0x2c4   :  { %v3382_v6 = vpop.eup %3381  ;;  %v526_v8 = vadd.f32 1.0, %v3380_v5 }
 0x2c5   :  { %v525_v9 = vadd.f32 1.0, %v3382_v6 }
 0x2c6   :  { %3395 = vrcp.f32 %v526_v8 }
 0x2c7   :  { %v3384_v13 = vpop.eup %3383  ;;  %3397 = vrcp.f32 %v525_v9 }
 0x2c8   :  { %v3386_v14 = vpop.eup %3385  ;;  %v528_v17 = vadd.f32 1.0, %v3384_v13 }
 0x2c9   :  { %v3388_v18 = vpop.eup %3387  ;;  %v546_v21 = vmul.f32 %v3386_v14, %v3646_v12 }
 0x2ca   :  { %v3390_v22 = vpop.eup %3389  ;;  %3399 = vrcp.f32 %v528_v17  ;;  %v545_v26 = vmul.f32 %v3388_v18, %v3644_v11 }
 0x2cb   :  { %v527_v27 = vadd.f32 1.0, %v3390_v22  ;;  %v3681_v28 = vadd.f32 %v564_v25, %v546_v21 }
 0x2cc   :  { %v3392_v29 = vpop.eup %3391  ;;  %v3683_v31 = vadd.f32 %v562_v7, %v545_v26 }
 0x2cd   :  { %v3394_v32 = vpop.eup %3393  ;;  %3401 = vrcp.f32 %v527_v27  ;;  %v548_v33 = vmul.f32 %v3392_v29, %v3654_v16  ;;  %v725_v11 = vmul.f32 %v3681_v28, %v3681_v28 }
 0x2ce   :  { %3070 = vmatprep.mubr.msk.f32.mxu1 %vm231_vm2, %v3683_v31  ;;  %v724_v12 = vmul.f32 %v3683_v31, %v3683_v31  ;;  %v547_v34 = vmul.f32 %v3394_v32, %v3652_v15 }
 0x2cf   :  { %3071 = vmatmul.mubr.msk.f32.vlgmr.msra.gmra.mrb[4].mxu1 %vm231_vm2, %v3681_v28  ;;  %v3695_v35 = vadd.f32 %v568_v30, %v548_v33 }
 0x2d0   :  { %v3396_v36 = vpop.eup %3395  ;;  %3086 = vmatprep.mubr.msk.f32.mxu0 %vm231_vm2, %v724_v12  ;;  %v3698_v16 = vadd.f32 %v566_v10, %v547_v34 }
 0x2d1   :  { %v3398_v37 = vpop.eup %3397  ;;  %3087 = vmatmul.mubr.msk.f32.vlgmr.msra.gmra.mrb[20].mxu0 %vm231_vm2, %v725_v11  ;;  %v550_v38 = vmul.f32 %v3396_v36, %v3662_v20  ;;  %v727_v42 = vmul.f32 %v3695_v35, %v3695_v35 }
 0x2d2   :  { %3073 = vmatprep.mubr.msk.f32.mxu1 %vm231_vm2, %v3698_v16  ;;  %v726_v15 = vmul.f32 %v3698_v16, %v3698_v16  ;;  %v549_v40 = vmul.f32 %v3398_v37, %v3660_v19 }
 0x2d3   :  { %3074 = vmatmul.mubr.msk.f32.gmra.mrb[6].mxu1 %vm231_vm2, %v3695_v35  ;;  %v3711_v43 = vadd.f32 %v572_v39, %v550_v38 }
 0x2d4   :  { %v3400_v44 = vpop.eup %3399  ;;  %3089 = vmatprep.mubr.msk.f32.mxu0 %vm231_vm2, %v726_v15  ;;  %v3714_v20 = vadd.f32 %v570_v41, %v549_v40 }
 0x2d5   :  { %3090 = vmatmul.mubr.msk.f32.gmra.mrb[22].mxu0 %vm231_vm2, %v727_v42  ;;  %v552_v45 = vmul.f32 %v3400_v44, %v3670_v24  ;;  %v729_v47 = vmul.f32 %v3711_v43, %v3711_v43 }
 0x2d6   :  { %3076 = vmatprep.mubr.msk.f32.mxu1 %vm231_vm2, %v3714_v20  ;;  %v728_v19 = vmul.f32 %v3714_v20, %v3714_v20 }
 0x2d7   :  { %v3402_v46 = vpop.eup %3401  ;;  %3077 = vmatmul.mubr.msk.f32.gmra.mrb[8].mxu1 %vm231_vm2, %v3711_v43  ;;  %v3729_v24 = vadd.f32 %v576_v48, %v552_v45 }
 0x2d8   :  { %3092 = vmatprep.mubr.msk.f32.mxu0 %vm231_vm2, %v728_v19  ;;  %v551_v49 = vmul.f32 %v3402_v46, %v3668_v23  ;;  %v943_v23 = vld [vmem:[#allocation2 + $0x38] sm:$0xff] }
 0x2d9   :  { %3093 = vmatmul.mubr.msk.f32.gmra.mrb[24].mxu0 %vm231_vm2, %v729_v47  ;;  %v731_v53 = vmul.f32 %v3729_v24, %v3729_v24  ;;  %v3292_v55 = vpack.c.bf16 %v944_v54, %v943_v23  ;;  %v2758_v47 = vld [vmem:[%s4086_s2 + $0x3] ss:$0 sm:$0xff] }
 0x2da   :  { %v3731_v51 = vadd.f32 %v574_v50, %v551_v49 }
 0x2db   :  { %3293 = vmatprep.subr.bf16.mxu1 %v3292_v55 }
 0x2dc   :  { %3079 = vmatprep.mubr.msk.f32.mxu1 %vm231_vm2, %v3731_v51  ;;  %v730_v52 = vmul.f32 %v3731_v51, %v3731_v51  ;;  %3295 = vmatpush3.bf16.msra.mxu1 %v3292_v55 }
 0x2dd   :  { %3080 = vmatmul.mubr.msk.f32.gmra.mrb[10].mxu1 %vm231_vm2, %v3729_v24 }
 0x2de   :  { %3095 = vmatprep.mubr.msk.f32.mxu0 %vm231_vm2, %v730_v52 }
 0x2df   :  { %3096 = vmatmul.mubr.msk.f32.gmra.mrb[26].mxu0 %vm231_vm2, %v731_v53 }
 0x3a2   :  { %v3072_v56 = vpop.f32.mrb[4].mxu1 }
 0x3a3   :  { %v862_v57 = vmul.f32 %v3072_v56, %v3072_v56  ;;  %v685_v58 = vpop.f32.mrb[5].mxu1  ;;  %v886_v44 = vsub.f32 %v3681_v28, %v3072_v56  ;;  %v2759_v28 = vld [vmem:[%s4086_s2 + $0x4] ss:$0 sm:$0xff] }
 0x3a4   :  { %v861_v59 = vmul.f32 %v685_v58, %v685_v58  ;;  %v3088_v60 = vpop.f32.mrb[20].mxu0  ;;  %v885_v46 = vsub.f32 %v3683_v31, %v685_v58 }
 0x3a5   :  { %v870_v61 = vsub.f32 %v3088_v60, %v862_v57  ;;  %v822_v62 = vpop.f32.mrb[21].mxu0 }
 0x3a6   :  { %v869_v63 = vsub.f32 %v822_v62, %v861_v59  ;;  %v3743_v0 = vpop.f32.mrb[6].mxu1 }
 0x3a7   :  { %v878_v1 = vmax.f32 %v870_v61, 0.0  ;;  %v864_v2 = vmul.f32 %v3743_v0, %v3743_v0  ;;  %v695_v3 = vpop.f32.mrb[7].mxu1  ;;  %v888_v55 = vsub.f32 %v3695_v35, %v3743_v0 }
 0x3a8   :  { %v877_v4 = vmax.f32 %v869_v63, 0.0  ;;  %v863_v5 = vmul.f32 %v695_v3, %v695_v3  ;;  %v3091_v6 = vpop.f32.mrb[22].mxu0  ;;  %v887_v57 = vsub.f32 %v3698_v16, %v695_v3 }
 0x3a9   :  { %v894_v7 = vadd.f32 1e-05, %v878_v1  ;;  %v872_v8 = vsub.f32 %v3091_v6, %v864_v2  ;;  %v832_v9 = vpop.f32.mrb[23].mxu0 }
 0x3aa   :  { %v893_v10 = vadd.f32 1e-05, %v877_v4  ;;  %v871_v13 = vsub.f32 %v832_v9, %v863_v5  ;;  %v3747_v14 = vpop.f32.mrb[8].mxu1 }
 0x3ab   :  { %3403 = vrsqrt.f32 %v894_v7  ;;  %v880_v17 = vmax.f32 %v872_v8, 0.0  ;;  %v866_v18 = vmul.f32 %v3747_v14, %v3747_v14  ;;  %v705_v21 = vpop.f32.mrb[9].mxu1  ;;  %v890_v1 = vsub.f32 %v3711_v43, %v3747_v14 }
 0x3ac   :  { %3405 = vrsqrt.f32 %v893_v10  ;;  %v879_v22 = vmax.f32 %v871_v13, 0.0  ;;  %v865_v25 = vmul.f32 %v705_v21, %v705_v21  ;;  %v3094_v26 = vpop.f32.mrb[24].mxu0  ;;  %v889_v35 = vsub.f32 %v3714_v20, %v705_v21 }
 0x3ad   :  { %v896_v27 = vadd.f32 1e-05, %v880_v17  ;;  %v874_v29 = vsub.f32 %v3094_v26, %v866_v18  ;;  %v842_v30 = vpop.f32.mrb[25].mxu0 }
 0x3ae   :  { %v895_v32 = vadd.f32 1e-05, %v879_v22  ;;  %v873_v33 = vsub.f32 %v842_v30, %v865_v25 }
 0x3af   :  { %3407 = vrsqrt.f32 %v896_v27  ;;  %v882_v12 = vmax.f32 %v874_v29, 0.0  ;;  %v2760_v27 = vld [vmem:[%s4086_s2 + $0x5] ss:$0 sm:$0xff] }
 0x3b0   :  { %3409 = vrsqrt.f32 %v895_v32  ;;  %v881_v34 = vmax.f32 %v873_v33, 0.0  ;;  %v3081_v11 = vpop.f32.mrb[10].mxu1 }
 0x3b1   :  { %v898_v36 = vadd.f32 1e-05, %v882_v12  ;;  %v868_v37 = vmul.f32 %v3081_v11, %v3081_v11  ;;  %v715_v38 = vpop.f32.mrb[11].mxu1  ;;  %v892_v20 = vsub.f32 %v3729_v24, %v3081_v11 }
 0x3b2   :  { %v897_v39 = vadd.f32 1e-05, %v881_v34  ;;  %v867_v15 = vmul.f32 %v715_v38, %v715_v38  ;;  %v3097_v40 = vpop.f32.mrb[26].mxu0  ;;  %v891_v10 = vsub.f32 %v3731_v51, %v715_v38  ;;  %v1127_v51 = vld [vmem:[#allocation2 + $0x48] sm:$0xf] }
 0x3b3   :  { %3411 = vrsqrt.f32 %v898_v36  ;;  %v876_v41 = vsub.f32 %v3097_v40, %v868_v37  ;;  %v852_v42 = vpop.f32.mrb[27].mxu0  ;;  %3114 = vmatprep.subr.msk.mxu0 %vm67_vm0, %v1127_v51  ;;  %v1265_v36 = vld [vmem:[#allocation2 + $0x50] sm:$0xf] }
 0x3b4   :  { %3413 = vrsqrt.f32 %v897_v39  ;;  %v875_v45 = vsub.f32 %v852_v42, %v867_v15  ;;  %3115 = vmatpush3.msk.msra.mxu0 %vm67_vm0, %v1127_v51  ;;  %3128 = vmatprep.subr.msk.mxu1 %vm67_vm0, %v1265_v36 }
 0x3b5   :  { %v3404_v19 = vpop.eup %3403  ;;  %v884_v48 = vmax.f32 %v876_v41, 0.0 }
 0x3b6   :  { %v3406_v49 = vpop.eup %3405  ;;  %v910_v50 = vmul.f32 %v3404_v19, %v886_v44  ;;  %v883_v52 = vmax.f32 %v875_v45, 0.0 }
 0x3b7   :  { %v900_v53 = vadd.f32 1e-05, %v884_v48  ;;  %v909_v23 = vmul.f32 %v3406_v49, %v885_v46 }
 0x3b8   :  { %v923_v54 = vmul.f32 %v2758_v47, %v910_v50  ;;  %v899_v56 = vadd.f32 1e-05, %v883_v52 }
 0x3b9   :  { %v3408_v31 = vpop.eup %3407  ;;  %3415 = vrsqrt.f32 %v900_v53  ;;  %v922_v58 = vmul.f32 %v2758_v47, %v909_v23 }
 0x3ba   :  { %v3410_v59 = vpop.eup %3409  ;;  %3417 = vrsqrt.f32 %v899_v56  ;;  %v912_v60 = vmul.f32 %v3408_v31, %v888_v55  ;;  %v3764_v63 = vadd.f32 %v2759_v28, %v923_v54 }
 0x3bb   :  { %v3762_v61 = vadd.f32 %v2759_v28, %v922_v58  ;;  %v911_v62 = vmul.f32 %v3410_v59, %v887_v57 }
 0x3bc   :  { %v925_v2 = vmul.f32 %v2758_v47, %v912_v60 }
 0x3bd   :  { %v3412_v4 = vpop.eup %3411  ;;  %3102 = vmatprep.mubr.msk.f32.mxu1 %vm231_vm2, %v3762_v61  ;;  %v924_v16 = vmul.f32 %v2758_v47, %v911_v62 }
 0x3be   :  { %v3414_v0 = vpop.eup %3413  ;;  %3103 = vmatmul.mubr.msk.f32.vlgmr.msra.gmra.mrb[12].mxu1 %vm231_vm2, %v3764_v63  ;;  %v914_v3 = vmul.f32 %v3412_v4, %v890_v1  ;;  %v3775_v7 = vadd.f32 %v2759_v28, %v925_v2 }
 0x3bf   :  { %v3773_v5 = vadd.f32 %v2759_v28, %v924_v16  ;;  %v913_v6 = vmul.f32 %v3414_v0, %v889_v35  ;;  %3129 = vmatpush3.msk.msra.mxu1 %vm67_vm0, %v1265_v36 }
 0x3c0   :  { %v927_v8 = vmul.f32 %v2758_v47, %v914_v3 }
 0x3c1   :  { %3105 = vmatprep.mubr.msk.f32.mxu1 %vm231_vm2, %v3773_v5  ;;  %v926_v43 = vmul.f32 %v2758_v47, %v913_v6 }
 0x3c2   :  { %3106 = vmatmul.mubr.msk.f32.gmra.mrb[14].mxu1 %vm231_vm2, %v3775_v7  ;;  %v3785_v17 = vadd.f32 %v2759_v28, %v927_v8 }
 0x3c3   :  { %v3416_v9 = vpop.eup %3415  ;;  %v3783_v13 = vadd.f32 %v2759_v28, %v926_v43 }
 0x3c4   :  { %v3418_v14 = vpop.eup %3417  ;;  %v916_v18 = vmul.f32 %v3416_v9, %v892_v20 }
 0x3c5   :  { %3108 = vmatprep.mubr.msk.f32.mxu1 %vm231_vm2, %v3783_v13  ;;  %v915_v21 = vmul.f32 %v3418_v14, %v891_v10 }
 0x3c6   :  { %3109 = vmatmul.mubr.msk.f32.gmra.mrb[16].mxu1 %vm231_vm2, %v3785_v17  ;;  %v929_v24 = vmul.f32 %v2758_v47, %v916_v18 }
 0x3c7   :  { %v928_v22 = vmul.f32 %v2758_v47, %v915_v21 }
 0x3c8   :  { %v3793_v26 = vadd.f32 %v2759_v28, %v929_v24 }
 0x3c9   :  { %v3791_v25 = vadd.f32 %v2759_v28, %v928_v22 }
 0x3cb   :  { %3111 = vmatprep.mubr.msk.f32.mxu1 %vm231_vm2, %v3791_v25 }
 0x3cc   :  { %3112 = vmatmul.mubr.msk.f32.gmra.mrb[18].mxu1 %vm231_vm2, %v3793_v26 }
 0x491   :  { %v3104_v29 = vpop.f32.mrb[12].mxu1 }
 0x492   :  { %v1046_v30 = vadd.f32 %v3104_v29, %v2760_v27  ;;  %v1040_v32 = vpop.f32.mrb[13].mxu1 }
 0x493   :  { %v1041_v33 = vadd.f32 %v2760_v27, %v1040_v32 }
 0x494   :  { %v1088_v12 = vmin.f32 %v1046_v30, 0.0  ;;  %1469 = vrot.lane.b32.xlu1 %v1046_v30, %s3543_s26  ;;  %vm1080_vm12 = vcmp.gt.f32.partialorder %v1046_v30, 0.0 }
 0x495   :  { %v1087_v34 = vmin.f32 %v1041_v33, 0.0  ;;  %v3107_v11 = vpop.f32.mrb[14].mxu1  ;;  %1467 = vrot.lane.b32.xlu0 %v1041_v33, %s3543_s26  ;;  %vm1079_vm11 = vcmp.gt.f32.partialorder %v1041_v33, 0.0 }
 0x496   :  { %v1097_v37 = vmul.f32 1.442695, %v1088_v12  ;;  %v1056_v38 = vadd.f32 %v3107_v11, %v2760_v27  ;;  %v1050_v39 = vpop.f32.mrb[15].mxu1 }
 0x497   :  { %v1095_v15 = vmul.f32 1.442695, %v1087_v34  ;;  %v1051_v40 = vadd.f32 %v2760_v27, %v1050_v39 }
 0x498   :  { %3419 = vpow2.f32 %v1097_v37  ;;  %v1090_v41 = vmin.f32 %v1056_v38, 0.0  ;;  %1473 = vrot.lane.b32.xlu1 %v1056_v38, %s3543_s26  ;;  %vm1082_vm14 = vcmp.gt.f32.partialorder %v1056_v38, 0.0 }
 0x499   :  { %3421 = vpow2.f32 %v1095_v15  ;;  %v1089_v42 = vmin.f32 %v1051_v40, 0.0  ;;  %v3110_v44 = vpop.f32.mrb[16].mxu1  ;;  %1471 = vrot.lane.b32.xlu0 %v1051_v40, %s3543_s26  ;;  %vm1081_vm13 = vcmp.gt.f32.partialorder %v1051_v40, 0.0 }
 0x49a   :  { %v1101_v45 = vmul.f32 1.442695, %v1090_v41  ;;  %v1066_v19 = vadd.f32 %v3110_v44, %v2760_v27  ;;  %v1060_v46 = vpop.f32.mrb[17].mxu1 }
 0x49b   :  { %v1099_v47 = vmul.f32 1.442695, %v1089_v42  ;;  %v1061_v48 = vadd.f32 %v2760_v27, %v1060_v46  ;;  %v2787_v46 = vld [vmem:[%s4086_s2 + $0x7] ss:$0 sm:$0xff] }
 0x49c   :  { %3423 = vpow2.f32 %v1101_v45  ;;  %v1092_v49 = vmin.f32 %v1066_v19, 0.0  ;;  %1477 = vrot.lane.b32.xlu1 %v1066_v19, %s3543_s26  ;;  %vm1084_vm3 = vcmp.gt.f32.partialorder %v1066_v19, 0.0 }
 0x49d   :  { %3425 = vpow2.f32 %v1099_v47  ;;  %v1091_v50 = vmin.f32 %v1061_v48, 0.0  ;;  %1475 = vrot.lane.b32.xlu0 %v1061_v48, %s3543_s26  ;;  %vm1083_vm15 = vcmp.gt.f32.partialorder %v1061_v48, 0.0 }
 0x49e   :  { %v1105_v52 = vmul.f32 1.442695, %v1092_v49 }
 0x49f   :  { %v1103_v53 = vmul.f32 1.442695, %v1091_v50  ;;  %v3113_v23 = vpop.f32.mrb[18].mxu1 }
 0x4a0   :  { %3427 = vpow2.f32 %v1105_v52  ;;  %v1076_v54 = vadd.f32 %v3113_v23, %v2760_v27  ;;  %v1070_v28 = vpop.f32.mrb[19].mxu1 }
 0x4a1   :  { %3429 = vpow2.f32 %v1103_v53  ;;  %v1071_v55 = vadd.f32 %v2760_v27, %v1070_v28 }
 0x4a2   :  { %v3420_v56 = vpop.eup %3419  ;;  %v1094_v31 = vmin.f32 %v1076_v54, 0.0  ;;  %1481 = vrot.lane.b32.xlu1 %v1076_v54, %s3543_s26  ;;  %vm1086_vm5 = vcmp.gt.f32.partialorder %v1076_v54, 0.0 }
 0x4a3   :  { %v3422_v57 = vpop.eup %3421  ;;  %v2770_v58 = vadd.f32 -1.0, %v3420_v56  ;;  %v1093_v59 = vmin.f32 %v1071_v55, 0.0  ;;  %1479 = vrot.lane.b32.xlu0 %v1071_v55, %s3543_s26  ;;  %vm1085_vm4 = vcmp.gt.f32.partialorder %v1071_v55, 0.0 }
 0x4a4   :  { %v1109_v60 = vmul.f32 1.442695, %v1094_v31  ;;  %v2769_v62 = vadd.f32 -1.0, %v3422_v57 }
 0x4a5   :  { %v1107_v1 = vmul.f32 1.442695, %v1093_v59  ;;  %v1120_v16 = vsel %vm1080_vm12, %v1046_v30, %v2770_v58  ;;  %v2777_v30 = vld [vmem:[%s4086_s2 + $0x6] ss:$0 sm:$0xff] }
 0x4a6   :  { %v3424_v2 = vpop.eup %3423  ;;  %3431 = vpow2.f32 %v1109_v60  ;;  %v1119_v4 = vsel %vm1079_vm11, %v1041_v33, %v2769_v62 }
 0x4a7   :  { %v3426_v35 = vpop.eup %3425  ;;  %3433 = vpow2.f32 %v1107_v1  ;;  %3116 = vmatprep.mubr.msk.f32.mxu0 %vm42_vm1, %v1119_v4  ;;  %v2772_v0 = vadd.f32 -1.0, %v3424_v2 }
 0x4a8   :  { %3117 = vmatmul.mubr.msk.f32.vlgmr.msra.gmra.mrb[28].mxu0 %vm42_vm1, %v1120_v16  ;;  %v2771_v3 = vadd.f32 -1.0, %v3426_v35 }
 0x4a9   :  { %v1122_v20 = vsel %vm1082_vm14, %v1056_v38, %v2772_v0 }
 0x4aa   :  { %v3428_v6 = vpop.eup %3427  ;;  %v1121_v8 = vsel %vm1081_vm13, %v1051_v40, %v2771_v3 }
 0x4ab   :  { %v3430_v43 = vpop.eup %3429  ;;  %3119 = vmatprep.mubr.msk.f32.mxu0 %vm42_vm1, %v1121_v8  ;;  %v2774_v9 = vadd.f32 -1.0, %v3428_v6 }
 0x4ac   :  { %3120 = vmatmul.mubr.msk.f32.gmra.mrb[30].mxu0 %vm42_vm1, %v1122_v20  ;;  %v2773_v10 = vadd.f32 -1.0, %v3430_v43 }
 0x4ad   :  { %v1124_v18 = vsel %vm1084_vm3, %v1066_v19, %v2774_v9 }
 0x4ae   :  { %v1123_v14 = vsel %vm1083_vm15, %v1061_v48, %v2773_v10 }
 0x4af   :  { %3122 = vmatprep.mubr.msk.f32.mxu0 %vm42_vm1, %v1123_v14 }
 0x4b0   :  { %v3432_v21 = vpop.eup %3431  ;;  %3123 = vmatmul.mubr.msk.f32.gmra.mrb[32].mxu0 %vm42_vm1, %v1124_v18 }
 0x4b1   :  { %v3434_v24 = vpop.eup %3433  ;;  %v2776_v22 = vadd.f32 -1.0, %v3432_v21 }
 0x4b2   :  { %v2775_v51 = vadd.f32 -1.0, %v3434_v24 }
 0x4b3   :  { %v1126_v29 = vsel %vm1086_vm5, %v1076_v54, %v2776_v22 }
 0x4b4   :  { %v1125_v27 = vsel %vm1085_vm4, %v1071_v55, %v2775_v51 }
 0x4b5   :  { %3125 = vmatprep.mubr.msk.f32.mxu0 %vm42_vm1, %v1125_v27 }
 0x4b6   :  { %3126 = vmatmul.mubr.msk.f32.gmra.mrb[34].mxu0 %vm42_vm1, %v1126_v29 }
 0x57b   :  { %v3118_v32 = vpop.f32.mrb[28].mxu0 }
 0x57c   :  { %v1226_v33 = vpop.f32.mrb[29].mxu0  ;;  %v3827_v34 = vadd.f32 %v3118_v32, %v2777_v30 }
 0x57d   :  { %v3825_v12 = vadd.f32 %v2777_v30, %v1226_v33 }
 0x57f   :  { %v3121_v11 = vpop.f32.mrb[30].mxu0  ;;  %3130 = vmatprep.mubr.msk.f32.mxu1 %vm42_vm1, %v3825_v12 }
 0x580   :  { %v1236_v36 = vpop.f32.mrb[31].mxu0  ;;  %3131 = vmatmul.mubr.msk.f32.vlgmr.msra.gmra.mrb[20].mxu1 %vm42_vm1, %v3827_v34  ;;  %v3835_v38 = vadd.f32 %v3121_v11, %v2777_v30 }
 0x581   :  { %v3833_v37 = vadd.f32 %v2777_v30, %v1236_v36 }
 0x583   :  { %v3124_v39 = vpop.f32.mrb[32].mxu0  ;;  %3133 = vmatprep.mubr.msk.f32.mxu1 %vm42_vm1, %v3833_v37 }
 0x584   :  { %v1246_v15 = vpop.f32.mrb[33].mxu0  ;;  %3134 = vmatmul.mubr.msk.f32.gmra.mrb[22].mxu1 %vm42_vm1, %v3835_v38  ;;  %v3843_v41 = vadd.f32 %v3124_v39, %v2777_v30 }
 0x585   :  { %v3841_v40 = vadd.f32 %v2777_v30, %v1246_v15  ;;  %v1470_v15 = vpop.permute.xlu1 %1469 }
 0x587   :  { %3136 = vmatprep.mubr.msk.f32.mxu1 %vm42_vm1, %v3841_v40 }
 0x588   :  { %3137 = vmatmul.mubr.msk.f32.gmra.mrb[24].mxu1 %vm42_vm1, %v3843_v41 }
 0x589   :  { %v3127_v42 = vpop.f32.mrb[34].mxu0 }
 0x58a   :  { %v1256_v44 = vpop.f32.mrb[35].mxu0  ;;  %v3851_v19 = vadd.f32 %v3127_v42, %v2777_v30  ;;  %v1468_v42 = vpop.permute.xlu0 %1467 }
 0x58b   :  { %v3849_v45 = vadd.f32 %v2777_v30, %v1256_v44 }
 0x58d   :  { %3139 = vmatprep.mubr.msk.f32.mxu1 %vm42_vm1, %v3849_v45 }
 0x58e   :  { %3140 = vmatmul.mubr.msk.f32.gmra.mrb[26].mxu1 %vm42_vm1, %v3851_v19 }
 0x653   :  { %v3132_v47 = vpop.f32.mrb[20].mxu1 }
 0x654   :  { %v1370_v48 = vadd.f32 %v3132_v47, %v2787_v46  ;;  %v1364_v49 = vpop.f32.mrb[21].mxu1 }
 0x655   :  { %v1365_v50 = vadd.f32 %v2787_v46, %v1364_v49 }
 0x656   :  { %v1404_v52 = vsub.f32 0.0, %v1370_v48 }
 0x657   :  { %v1403_v53 = vsub.f32 0.0, %v1365_v50  ;;  %v3135_v23 = vpop.f32.mrb[22].mxu1 }
 0x658   :  { %v1413_v54 = vmul.f32 1.442695, %v1404_v52  ;;  %v1380_v28 = vadd.f32 %v3135_v23, %v2787_v46  ;;  %v1374_v55 = vpop.f32.mrb[23].mxu1 }
 0x659   :  { %v1411_v56 = vmul.f32 1.442695, %v1403_v53  ;;  %v1375_v31 = vadd.f32 %v2787_v46, %v1374_v55 }
 0x65a   :  { %3435 = vpow2.f32 %v1413_v54  ;;  %v1406_v57 = vsub.f32 0.0, %v1380_v28 }
 0x65b   :  { %3437 = vpow2.f32 %v1411_v56  ;;  %v1405_v58 = vsub.f32 0.0, %v1375_v31  ;;  %v3138_v59 = vpop.f32.mrb[24].mxu1  ;;  %v1474_v56 = vpop.permute.xlu1 %1473 }
 0x65c   :  { %v1417_v60 = vmul.f32 1.442695, %v1406_v57  ;;  %v1390_v62 = vadd.f32 %v3138_v59, %v2787_v46  ;;  %v1384_v1 = vpop.f32.mrb[25].mxu1  ;;  %v1472_v31 = vpop.permute.xlu0 %1471 }
 0x65d   :  { %v1415_v2 = vmul.f32 1.442695, %v1405_v58  ;;  %v1385_v4 = vadd.f32 %v2787_v46, %v1384_v1 }
 0x65e   :  { %3439 = vpow2.f32 %v1417_v60  ;;  %v1408_v35 = vsub.f32 0.0, %v1390_v62 }
 0x65f   :  { %3441 = vpow2.f32 %v1415_v2  ;;  %v1407_v16 = vsub.f32 0.0, %v1385_v4 }
 0x660   :  { %v1421_v0 = vmul.f32 1.442695, %v1408_v35 }
 0x661   :  { %v1419_v3 = vmul.f32 1.442695, %v1407_v16  ;;  %v3141_v6 = vpop.f32.mrb[26].mxu1  ;;  %v1478_v16 = vpop.permute.xlu1 %1477 }
 0x662   :  { %3443 = vpow2.f32 %v1421_v0  ;;  %v1400_v8 = vadd.f32 %v3141_v6, %v2787_v46  ;;  %v1394_v43 = vpop.f32.mrb[27].mxu1  ;;  %v1476_v0 = vpop.permute.xlu0 %1475 }
 0x663   :  { %3445 = vpow2.f32 %v1419_v3  ;;  %v1395_v20 = vadd.f32 %v2787_v46, %v1394_v43 }
 0x664   :  { %v3436_v9 = vpop.eup %3435  ;;  %v1410_v10 = vsub.f32 0.0, %v1400_v8 }
 0x665   :  { %v3438_v14 = vpop.eup %3437  ;;  %v1428_v18 = vadd.f32 1.0, %v3436_v9  ;;  %v1409_v21 = vsub.f32 0.0, %v1395_v20  ;;  %v1482_v9 = vpop.permute.xlu1 %1481 }
 0x666   :  { %v1427_v24 = vadd.f32 1.0, %v3438_v14  ;;  %v1425_v22 = vmul.f32 1.442695, %v1410_v10  ;;  %v1480_v10 = vpop.permute.xlu0 %1479 }
 0x667   :  { %3447 = vrcp.f32 %v1428_v18  ;;  %v1423_v51 = vmul.f32 1.442695, %v1409_v21 }
 0x668   :  { %v3440_v27 = vpop.eup %3439  ;;  %3449 = vrcp.f32 %v1427_v24 }
 0x669   :  { %v3442_v29 = vpop.eup %3441  ;;  %v1430_v30 = vadd.f32 1.0, %v3440_v27  ;;  %3451 = vpow2.f32 %v1425_v22 }
 0x66a   :  { %v1429_v32 = vadd.f32 1.0, %v3442_v29  ;;  %3453 = vpow2.f32 %v1423_v51 }
 0x66b   :  { %3455 = vrcp.f32 %v1430_v30 }
 0x66c   :  { %v3444_v33 = vpop.eup %3443  ;;  %3457 = vrcp.f32 %v1429_v32 }
 0x66d   :  { %v3446_v11 = vpop.eup %3445  ;;  %v1432_v36 = vadd.f32 1.0, %v3444_v33 }
 0x66e   :  { %v1431_v39 = vadd.f32 1.0, %v3446_v11 }
 0x66f   :  { %3459 = vrcp.f32 %v1432_v36 }
 0x670   :  { %3461 = vrcp.f32 %v1431_v39 }
 0x671   :  { %v3448_v44 = vpop.eup %3447 }
 0x672   :  { %v3450_v46 = vpop.eup %3449  ;;  %v1452_v47 = vmul.f32 %v3448_v44, %v3827_v34 }
 0x673   :  { %v3452_v48 = vpop.eup %3451  ;;  %v1451_v49 = vmul.f32 %v3450_v46, %v3825_v12 }
 0x674   :  { %v3454_v50 = vpop.eup %3453  ;;  %v1434_v52 = vadd.f32 1.0, %v3452_v48  ;;  %v1492_v53 = vadd.f32 %v1470_v15, %v1452_v47 }
 0x675   :  { %v3456_v23 = vpop.eup %3455  ;;  %v1433_v54 = vadd.f32 1.0, %v3454_v50  ;;  %v1491_v28 = vadd.f32 %v1468_v42, %v1451_v49 }
 0x676   :  { %v3458_v55 = vpop.eup %3457  ;;  %3463 = vrcp.f32 %v1434_v52  ;;  %v1502_v57 = vsel %vm42_vm1, %v1492_v53, 0.0  ;;  %v1454_v12 = vmul.f32 %v3456_v23, %v3835_v38 }
 0x677   :  { %3465 = vrcp.f32 %v1433_v54  ;;  %1503 = vadd.xlane.f32.xlu1 %v1502_v57  ;;  %v1499_v58 = vsel %vm42_vm1, %v1491_v28, 0.0  ;;  %v1453_v34 = vmul.f32 %v3458_v55, %v3833_v37 }
 0x678   :  { %1500 = vadd.xlane.f32.xlu0 %v1499_v58  ;;  %v1494_v4 = vadd.f32 %v1474_v56, %v1454_v12 }
 0x679   :  { %v3460_v59 = vpop.eup %3459  ;;  %v1493_v60 = vadd.f32 %v1472_v31, %v1453_v34 }
 0x67a   :  { %v3462_v62 = vpop.eup %3461  ;;  %v1456_v35 = vmul.f32 %v3460_v59, %v3843_v41  ;;  %v1508_v37 = vsel %vm42_vm1, %v1494_v4, 0.0 }
 0x67b   :  { %v1505_v1 = vsel %vm42_vm1, %v1493_v60, 0.0  ;;  %v1455_v2 = vmul.f32 %v3462_v62, %v3841_v40 }
 0x67c   :  { %1506 = vadd.xlane.f32.xlu0 %v1505_v1  ;;  %v1496_v38 = vadd.f32 %v1478_v16, %v1456_v35 }
 0x67d   :  { %v1495_v3 = vadd.f32 %v1476_v0, %v1455_v2 }
 0x67e   :  { %v1514_v41 = vsel %vm42_vm1, %v1496_v38, 0.0 }
 0x67f   :  { %v1511_v6 = vsel %vm42_vm1, %v1495_v3, 0.0 }
 0x680   :  { %v3464_v8 = vpop.eup %3463  ;;  %1512 = vadd.xlane.f32.xlu1 %v1511_v6  ;;  %1509 = vadd.xlane.f32.xlu0 %v1508_v37 }
 0x681   :  { %v3466_v43 = vpop.eup %3465  ;;  %v1458_v20 = vmul.f32 %v3464_v8, %v3851_v19 }
 0x682   :  { %v1457_v40 = vmul.f32 %v3466_v43, %v3849_v45 }
 0x683   :  { %v1498_v14 = vadd.f32 %v1482_v9, %v1458_v20 }
 0x684   :  { %1515 = vadd.xlane.f32.xlu0 %v1514_v41  ;;  %v1497_v18 = vadd.f32 %v1480_v10, %v1457_v40 }
 0x685   :  { %v1520_v24 = vsel %vm42_vm1, %v1498_v14, 0.0 }
 0x686   :  { %v1517_v21 = vsel %vm42_vm1, %v1497_v18, 0.0 }
 0x687   :  { %1518 = vadd.xlane.f32.xlu1 %v1517_v21 }
 0x688   :  { %1521 = vadd.xlane.f32.xlu0 %v1520_v24 }
 0x704   :  { %v1504_v22 = vpop.xlane.xlu1 %1503 }
 0x705   :  { %v1525_v51 = vmul.f32 0.25, %v1504_v22  ;;  %v1501_v27 = vpop.xlane.xlu0 %1500 }
 0x706   :  { %v1524_v29 = vmul.f32 0.25, %v1501_v27  ;;  %v2797_v27 = vld [vmem:[%s4086_s2 + $0x8] ss:$0 sm:$0xff] }
 0x707   :  { %v3876_v19 = vsub.f32 %v1492_v53, %v1525_v51 }
 0x708   :  { %v3878_v30 = vsub.f32 %v1491_v28, %v1524_v29 }
 0x709   :  { %v1507_v45 = vpop.xlane.xlu0 %1506  ;;  %v1541_v32 = vmul.f32 %v3876_v19, %v3876_v19 }
 0x70a   :  { %v1526_v33 = vmul.f32 0.25, %v1507_v45  ;;  %v1540_v11 = vmul.f32 %v3878_v30, %v3878_v30 }
 0x70b   :  { %v1551_v36 = vsel %vm42_vm1, %v1541_v32, 0.0 }
 0x70c   :  { %v3885_v39 = vsub.f32 %v1493_v60, %v1526_v33  ;;  %1552 = vadd.xlane.f32.xlu0 %v1551_v36  ;;  %v1548_v15 = vsel %vm42_vm1, %v1540_v11, 0.0 }
 0x70d   :  { %v1513_v42 = vpop.xlane.xlu1 %1512  ;;  %v1510_v44 = vpop.xlane.xlu0 %1509  ;;  %1549 = vadd.xlane.f32.xlu1 %v1548_v15  ;;  %v2798_v15 = vld [vmem:[%s4086_s2 + $0x9] ss:$0 sm:$0xff] }
 0x70e   :  { %v1528_v46 = vmul.f32 0.25, %v1513_v42  ;;  %v1527_v47 = vmul.f32 0.25, %v1510_v44  ;;  %v1542_v48 = vmul.f32 %v3885_v39, %v3885_v39 }
 0x710   :  { %v3890_v49 = vsub.f32 %v1495_v3, %v1528_v46  ;;  %v3892_v50 = vsub.f32 %v1494_v4, %v1527_v47  ;;  %v1554_v52 = vsel %vm42_vm1, %v1542_v48, 0.0 }
 0x711   :  { %v1516_v53 = vpop.xlane.xlu0 %1515  ;;  %1555 = vadd.xlane.f32.xlu1 %v1554_v52 }
 0x712   :  { %v1529_v23 = vmul.f32 0.25, %v1516_v53  ;;  %v1543_v54 = vmul.f32 %v3892_v50, %v3892_v50  ;;  %v1544_v28 = vmul.f32 %v3890_v49, %v3890_v49 }
 0x714   :  { %v3899_v55 = vsub.f32 %v1496_v38, %v1529_v23  ;;  %v1519_v56 = vpop.xlane.xlu1 %1518  ;;  %v1557_v31 = vsel %vm42_vm1, %v1543_v54, 0.0  ;;  %v1560_v57 = vsel %vm42_vm1, %v1544_v28, 0.0 }
 0x715   :  { %v1530_v58 = vmul.f32 0.25, %v1519_v56  ;;  %1558 = vadd.xlane.f32.xlu0 %v1557_v31  ;;  %v1522_v34 = vpop.xlane.xlu0 %1521  ;;  %1561 = vadd.xlane.f32.xlu1 %v1560_v57 }
 0x716   :  { %v1531_v12 = vmul.f32 0.25, %v1522_v34  ;;  %v1545_v59 = vmul.f32 %v3899_v55, %v3899_v55 }
 0x717   :  { %v3905_v60 = vsub.f32 %v1497_v18, %v1530_v58 }
 0x718   :  { %v3907_v62 = vsub.f32 %v1498_v14, %v1531_v12  ;;  %v1563_v1 = vsel %vm42_vm1, %v1545_v59, 0.0 }
 0x719   :  { %1564 = vadd.xlane.f32.xlu0 %v1563_v1  ;;  %v1546_v2 = vmul.f32 %v3905_v60, %v3905_v60 }
 0x71a   :  { %v1547_v4 = vmul.f32 %v3907_v62, %v3907_v62 }
 0x71b   :  { %v1566_v35 = vsel %vm42_vm1, %v1546_v2, 0.0 }
 0x71c   :  { %1567 = vadd.xlane.f32.xlu1 %v1566_v35  ;;  %v1569_v16 = vsel %vm42_vm1, %v1547_v4, 0.0 }
 0x71d   :  { %1570 = vadd.xlane.f32.xlu0 %v1569_v16 }
 0x799   :  { %v1553_v0 = vpop.xlane.xlu0 %1552 }
 0x79a   :  { %v1573_v3 = vmul.f32 0.25, %v1553_v0  ;;  %v1550_v6 = vpop.xlane.xlu1 %1549 }
 0x79b   :  { %v1572_v37 = vmul.f32 0.25, %v1550_v6 }
 0x79c   :  { %v1581_v38 = vadd.f32 1e-05, %v1573_v3 }
 0x79d   :  { %v1580_v8 = vadd.f32 1e-05, %v1572_v37 }
 0x79e   :  { %3467 = vrsqrt.f32 %v1581_v38  ;;  %v1556_v43 = vpop.xlane.xlu1 %1555 }
 0x79f   :  { %3469 = vrsqrt.f32 %v1580_v8  ;;  %v1574_v20 = vmul.f32 0.25, %v1556_v43 }
 0x7a1   :  { %v1582_v9 = vadd.f32 1e-05, %v1574_v20 }
 0x7a2   :  { %v1559_v40 = vpop.xlane.xlu0 %1558  ;;  %v1562_v10 = vpop.xlane.xlu1 %1561 }
 0x7a3   :  { %3471 = vrsqrt.f32 %v1582_v9  ;;  %v1575_v41 = vmul.f32 0.25, %v1559_v40  ;;  %v1576_v14 = vmul.f32 0.25, %v1562_v10 }
 0x7a5   :  { %v1583_v18 = vadd.f32 1e-05, %v1575_v41  ;;  %v1584_v21 = vadd.f32 1e-05, %v1576_v14 }
 0x7a6   :  { %v1565_v24 = vpop.xlane.xlu0 %1564 }
 0x7a7   :  { %3473 = vrsqrt.f32 %v1583_v18  ;;  %v1577_v22 = vmul.f32 0.25, %v1565_v24 }
 0x7a8   :  { %v3468_v51 = vpop.eup %3467  ;;  %3475 = vrsqrt.f32 %v1584_v21 }
 0x7a9   :  { %v3470_v29 = vpop.eup %3469  ;;  %v1585_v45 = vadd.f32 1e-05, %v1577_v22  ;;  %v1568_v32 = vpop.xlane.xlu1 %1567  ;;  %v1597_v33 = vmul.f32 %v3468_v51, %v3876_v19 }
 0x7aa   :  { %v1578_v11 = vmul.f32 0.25, %v1568_v32  ;;  %v1571_v36 = vpop.xlane.xlu0 %1570  ;;  %v1596_v42 = vmul.f32 %v3470_v29, %v3878_v30 }
 0x7ab   :  { %3477 = vrsqrt.f32 %v1585_v45  ;;  %v1579_v44 = vmul.f32 0.25, %v1571_v36  ;;  %v1610_v46 = vmul.f32 %v2797_v27, %v1597_v33 }
 0x7ac   :  { %v1586_v47 = vadd.f32 1e-05, %v1578_v11  ;;  %v1609_v48 = vmul.f32 %v2797_v27, %v1596_v42 }
 0x7ad   :  { %v3472_v52 = vpop.eup %3471  ;;  %v1587_v53 = vadd.f32 1e-05, %v1579_v44  ;;  %v1623_v23 = vadd.f32 %v2798_v15, %v1610_v46 }
 0x7ae   :  { %3479 = vrsqrt.f32 %v1586_v47  ;;  %v1622_v54 = vadd.f32 %v2798_v15, %v1609_v48  ;;  %v1598_v19 = vmul.f32 %v3472_v52, %v3885_v39 }
 0x7af   :  { %3481 = vrsqrt.f32 %v1587_v53  ;;  %v1633_v28 = vsel %vm42_vm1, %v1623_v23, -inf }
 0x7b0   :  { %1634 = vmax.xlane.f32.xlu0 %v1633_v28  ;;  %v1630_v56 = vsel %vm42_vm1, %v1622_v54, -inf  ;;  %v1611_v31 = vmul.f32 %v2797_v27, %v1598_v19 }
 0x7b1   :  { %v3474_v30 = vpop.eup %3473  ;;  %1631 = vmax.xlane.f32.xlu1 %v1630_v56 }
 0x7b2   :  { %v3476_v57 = vpop.eup %3475  ;;  %v1624_v58 = vadd.f32 %v2798_v15, %v1611_v31  ;;  %v1599_v34 = vmul.f32 %v3474_v30, %v3892_v50 }
 0x7b3   :  { %v1600_v12 = vmul.f32 %v3476_v57, %v3890_v49 }
 0x7b4   :  { %v1636_v59 = vsel %vm42_vm1, %v1624_v58, -inf  ;;  %v1612_v1 = vmul.f32 %v2797_v27, %v1599_v34 }
 0x7b5   :  { %v3478_v2 = vpop.eup %3477  ;;  %1637 = vmax.xlane.f32.xlu1 %v1636_v59  ;;  %v1613_v39 = vmul.f32 %v2797_v27, %v1600_v12 }
 0x7b6   :  { %v1625_v4 = vadd.f32 %v2798_v15, %v1612_v1  ;;  %v1601_v35 = vmul.f32 %v3478_v2, %v3899_v55 }
 0x7b7   :  { %v1626_v16 = vadd.f32 %v2798_v15, %v1613_v39 }
 0x7b8   :  { %v3480_v0 = vpop.eup %3479  ;;  %v1639_v3 = vsel %vm42_vm1, %v1625_v4, -inf  ;;  %v1614_v6 = vmul.f32 %v2797_v27, %v1601_v35 }
 0x7b9   :  { %v3482_v37 = vpop.eup %3481  ;;  %1640 = vmax.xlane.f32.xlu0 %v1639_v3  ;;  %v1642_v50 = vsel %vm42_vm1, %v1626_v16, -inf  ;;  %v1602_v49 = vmul.f32 %v3480_v0, %v3905_v60  ;;  %v1859_v0 = vld [vmem:[#allocation2 + $0x60] sm:$0xff]  ;;  %v1860_v3 = vld [vmem:[#allocation2 + $0x68] sm:$0xff] }
 0x7ba   :  { %1643 = vmax.xlane.f32.xlu1 %v1642_v50  ;;  %v1627_v38 = vadd.f32 %v2798_v15, %v1614_v6  ;;  %v1603_v8 = vmul.f32 %v3482_v37, %v3907_v62  ;;  %v3296_v6 = vpack.c.bf16 %v1860_v3, %v1859_v0  ;;  %v2442_v0 = vld [vmem:[#allocation2 + $0x118] sm:$0xf] }
 0x7bb   :  { %v1615_v43 = vmul.f32 %v2797_v27, %v1602_v49  ;;  %v2287_v3 = vld [vmem:[#allocation2 + $0xb8] sm:$0xff] }
 0x7bc   :  { %v1645_v20 = vsel %vm42_vm1, %v1627_v38, -inf  ;;  %v1616_v9 = vmul.f32 %v2797_v27, %v1603_v8  ;;  %3297 = vmatprep.subr.bf16.mxu1 %v3296_v6 }
 0x7bd   :  { %1646 = vmax.xlane.f32.xlu0 %v1645_v20  ;;  %v1628_v55 = vadd.f32 %v2798_v15, %v1615_v43  ;;  %3299 = vmatpush3.bf16.msra.mxu1 %v3296_v6  ;;  %v2288_v6 = vld [vmem:[#allocation2 + $0xc0] sm:$0xff] }
 0x7be   :  { %v1629_v40 = vadd.f32 %v2798_v15, %v1616_v9 }
 0x7bf   :  { %v1648_v10 = vsel %vm42_vm1, %v1628_v55, -inf }
 0x7c0   :  { %1649 = vmax.xlane.f32.xlu1 %v1648_v10  ;;  %v1651_v41 = vsel %vm42_vm1, %v1629_v40, -inf }
 0x7c1   :  { %1652 = vmax.xlane.f32.xlu0 %v1651_v41 }
 0x83d   :  { %v1635_v14 = vpop.xlane.xlu0 %1634 }
 0x83e   :  { %v1655_v18 = vsub.f32 %v1623_v23, %v1635_v14  ;;  %v1632_v60 = vpop.xlane.xlu1 %1631 }
 0x83f   :  { %v1654_v21 = vsub.f32 %v1622_v54, %v1632_v60 }
 0x840   :  { %v1664_v24 = vmul.f32 1.442695, %v1655_v18 }
 0x841   :  { %v1662_v22 = vmul.f32 1.442695, %v1654_v21 }
 0x842   :  { %3483 = vpow2.f32 %v1664_v24  ;;  %v1638_v62 = vpop.xlane.xlu1 %1637 }
 0x843   :  { %3485 = vpow2.f32 %v1662_v22  ;;  %v1656_v51 = vsub.f32 %v1624_v58, %v1638_v62 }
 0x845   :  { %v1666_v27 = vmul.f32 1.442695, %v1656_v51 }
 0x846   :  { %v1641_v29 = vpop.xlane.xlu0 %1640 }
 0x847   :  { %3487 = vpow2.f32 %v1666_v27  ;;  %v1657_v45 = vsub.f32 %v1625_v4, %v1641_v29  ;;  %v1644_v32 = vpop.xlane.xlu1 %1643 }
 0x848   :  { %v1658_v33 = vsub.f32 %v1626_v16, %v1644_v32  ;;  %v1718_v16 = vld [vmem:[#allocation2 + $0x58] sm:$0xf] }
 0x849   :  { %v1668_v11 = vmul.f32 1.442695, %v1657_v45  ;;  %3142 = vmatprep.subr.msk.mxu0 %vm67_vm0, %v1718_v16 }
 0x84a   :  { %v1670_v36 = vmul.f32 1.442695, %v1658_v33  ;;  %v1647_v15 = vpop.xlane.xlu0 %1646  ;;  %3143 = vmatpush3.msk.msra.mxu0 %vm67_vm0, %v1718_v16  ;;  %v1990_v33 = vld [vmem:[#allocation2 + $0x70] sm:$0xf] }
 0x84b   :  { %3489 = vpow2.f32 %v1668_v11  ;;  %v1659_v42 = vsub.f32 %v1627_v38, %v1647_v15  ;;  %3172 = vmatprep.subr.msk.mxu0 %vm67_vm0, %v1990_v33 }
 0x84c   :  { %v3484_v44 = vpop.eup %3483  ;;  %3491 = vpow2.f32 %v1670_v36 }
 0x84d   :  { %v3486_v46 = vpop.eup %3485  ;;  %v1672_v47 = vmul.f32 1.442695, %v1659_v42  ;;  %v1650_v48 = vpop.xlane.xlu1 %1649  ;;  %v1681_v52 = vsel %vm42_vm1, %v3484_v44, 0.0 }
 0x84e   :  { %v1660_v53 = vsub.f32 %v1628_v55, %v1650_v48  ;;  %1682 = vadd.xlane.f32.xlu0 %v1681_v52  ;;  %v1653_v23 = vpop.xlane.xlu0 %1652  ;;  %v1678_v54 = vsel %vm42_vm1, %v3486_v46, 0.0 }
 0x84f   :  { %3493 = vpow2.f32 %v1672_v47  ;;  %v1661_v19 = vsub.f32 %v1629_v40, %v1653_v23  ;;  %1679 = vadd.xlane.f32.xlu1 %v1678_v54 }
 0x850   :  { %v1674_v28 = vmul.f32 1.442695, %v1660_v53 }
 0x851   :  { %v3488_v56 = vpop.eup %3487  ;;  %v1676_v31 = vmul.f32 1.442695, %v1661_v19  ;;  %v2136_v19 = vld [vmem:[#allocation2 + $0x78] sm:$0xff] }
 0x852   :  { %3495 = vpow2.f32 %v1674_v28  ;;  %v1684_v30 = vsel %vm42_vm1, %v3488_v56, 0.0  ;;  %v2137_v28 = vld [vmem:[#allocation2 + $0x80] sm:$0xff] }
 0x853   :  { %3497 = vpow2.f32 %v1676_v31  ;;  %1685 = vadd.xlane.f32.xlu1 %v1684_v30  ;;  %v2139_v31 = vld [vmem:[#allocation2 + $0x90] sm:$0xff]  ;;  %v2140_v30 = vld [vmem:[#allocation2 + $0x98] sm:$0xff] }
 0x855   :  { %v3490_v57 = vpop.eup %3489 }
 0x856   :  { %v3492_v58 = vpop.eup %3491  ;;  %v1687_v34 = vsel %vm42_vm1, %v3490_v57, 0.0 }
 0x857   :  { %1688 = vadd.xlane.f32.xlu0 %v1687_v34  ;;  %v1690_v12 = vsel %vm42_vm1, %v3492_v58, 0.0 }
 0x858   :  { %1691 = vadd.xlane.f32.xlu1 %v1690_v12 }
 0x859   :  { %v3494_v59 = vpop.eup %3493 }
 0x85a   :  { %v1693_v1 = vsel %vm42_vm1, %v3494_v59, 0.0 }
 0x85b   :  { %1694 = vadd.xlane.f32.xlu0 %v1693_v1 }
 0x85c   :  { %v3496_v2 = vpop.eup %3495 }
 0x85d   :  { %v3498_v39 = vpop.eup %3497  ;;  %v1696_v4 = vsel %vm42_vm1, %v3496_v2, 0.0 }
 0x85e   :  { %1697 = vadd.xlane.f32.xlu1 %v1696_v4  ;;  %v1699_v35 = vsel %vm42_vm1, %v3498_v39, 0.0  ;;  %v2142_v4 = vld [vmem:[#allocation2 + $0xa8] sm:$0xff] }
 0x85f   :  { %1700 = vadd.xlane.f32.xlu0 %v1699_v35  ;;  %v2143_v35 = vld [vmem:[#allocation2 + $0xb0] sm:$0xff] }
 0x860   :  { %v3312_v16 = vpack.c.bf16 %v2143_v35, %v2142_v4 }
 0x8db   :  { %v1683_v37 = vpop.xlane.xlu0 %1682 }
 0x8dc   :  { %3499 = vrcp.f32 %v1683_v37  ;;  %v1680_v50 = vpop.xlane.xlu1 %1679  ;;  %v3316_v37 = vpack.c.bf16 %v2288_v6, %v2287_v3  ;;  %v2440_v6 = vld [vmem:[#allocation2 + $0x108] sm:$0xff] }
 0x8dd   :  { %3501 = vrcp.f32 %v1680_v50  ;;  %v2816_v50 = vld [vmem:[%s4086_s2 + $0xa] ss:$0 sm:$0xff] }
 0x8e0   :  { %v1686_v49 = vpop.xlane.xlu1 %1685 }
 0x8e1   :  { %3503 = vrcp.f32 %v1686_v49 }
 0x8e4   :  { %v1689_v38 = vpop.xlane.xlu0 %1688 }
 0x8e5   :  { %3505 = vrcp.f32 %v1689_v38  ;;  %v1692_v8 = vpop.xlane.xlu1 %1691 }
 0x8e6   :  { %v3500_v43 = vpop.eup %3499  ;;  %3507 = vrcp.f32 %v1692_v8 }
 0x8e7   :  { %v3502_v20 = vpop.eup %3501  ;;  %v3950_v40 = vmul.f32 %v3500_v43, %v3484_v44 }
 0x8e8   :  { %v1695_v9 = vpop.xlane.xlu0 %1694  ;;  %v3948_v55 = vmul.f32 %v3502_v20, %v3486_v46 }
 0x8e9   :  { %3509 = vrcp.f32 %v1695_v9 }
 0x8ea   :  { %3144 = vmatprep.mubr.msk.f32.mxu0 %vm42_vm1, %v3948_v55 }
 0x8eb   :  { %v3504_v10 = vpop.eup %3503  ;;  %v1698_v41 = vpop.xlane.xlu1 %1697  ;;  %3145 = vmatmul.mubr.msk.f32.vlgmr.msra.gmra.mrb[36].mxu0 %vm42_vm1, %v3950_v40 }
 0x8ec   :  { %3511 = vrcp.f32 %v1698_v41  ;;  %v1701_v14 = vpop.xlane.xlu0 %1700  ;;  %v3956_v18 = vmul.f32 %v3504_v10, %v3488_v56  ;;  %3173 = vmatpush3.msk.msra.mxu0 %vm67_vm0, %v1990_v33  ;;  %v2138_v56 = vld [vmem:[#allocation2 + $0x88] sm:$0xff] }
 0x8ed   :  { %3513 = vrcp.f32 %v1701_v14  ;;  %3317 = vmatprep.subr.bf16.mxu0 %v3316_v37 }
 0x8ee   :  { %3147 = vmatprep.mubr.msk.f32.mxu0 %vm42_vm1, %v3956_v18 }
 0x8ef   :  { %v3506_v60 = vpop.eup %3505 }
 0x8f0   :  { %v3508_v21 = vpop.eup %3507  ;;  %v3960_v24 = vmul.f32 %v3506_v60, %v3490_v57  ;;  %v2141_v57 = vld [vmem:[#allocation2 + $0xa0] sm:$0xff] }
 0x8f1   :  { %v3962_v22 = vmul.f32 %v3508_v21, %v3492_v58  ;;  %v3308_v58 = vpack.c.bf16 %v2141_v57, %v2140_v30 }
 0x8f2   :  { %3148 = vmatmul.mubr.msk.f32.gmra.mrb[38].mxu0 %vm42_vm1, %v3960_v24 }
 0x8f3   :  { %v3510_v62 = vpop.eup %3509  ;;  %3150 = vmatprep.mubr.msk.f32.mxu0 %vm42_vm1, %v3962_v22 }
 0x8f4   :  { %v3968_v51 = vmul.f32 %v3510_v62, %v3494_v59 }
 0x8f6   :  { %v3512_v27 = vpop.eup %3511  ;;  %3151 = vmatmul.mubr.msk.f32.gmra.mrb[40].mxu0 %vm42_vm1, %v3968_v51 }
 0x8f7   :  { %v3514_v29 = vpop.eup %3513  ;;  %v3972_v45 = vmul.f32 %v3512_v27, %v3496_v2 }
 0x8f8   :  { %v3974_v32 = vmul.f32 %v3514_v29, %v3498_v39 }
 0x8f9   :  { %3153 = vmatprep.mubr.msk.f32.mxu0 %vm42_vm1, %v3972_v45 }
 0x8fa   :  { %3154 = vmatmul.mubr.msk.f32.gmra.mrb[42].mxu0 %vm42_vm1, %v3974_v32 }
 0x9be   :  { %v3146_v11 = vpop.f32.mrb[36].mxu0 }
 0x9bf   :  { %v1812_v36 = vpop.f32.mrb[37].mxu0  ;;  %v1852_v42 = vmul.f32 %v3146_v11, %v3764_v63 }
 0x9c0   :  { %v1851_v15 = vmul.f32 %v1812_v36, %v3762_v61 }
 0x9c2   :  { %3160 = vmatprep.mubr.msk.f32.mxu1 %vm231_vm2, %v1851_v15 }
 0x9c3   :  { %3161 = vmatmul.mubr.msk.f32.vlgmr.msra.gmra.mrb[28].mxu1 %vm231_vm2, %v1852_v42 }
 0x9c5   :  { %v3149_v44 = vpop.f32.mrb[38].mxu0 }
 0x9c6   :  { %v1822_v46 = vpop.f32.mrb[39].mxu0  ;;  %v1854_v48 = vmul.f32 %v3149_v44, %v3775_v7 }
 0x9c7   :  { %v1853_v47 = vmul.f32 %v1822_v46, %v3773_v5 }
 0x9c9   :  { %v3152_v52 = vpop.f32.mrb[40].mxu0  ;;  %3163 = vmatprep.mubr.msk.f32.mxu1 %vm231_vm2, %v1853_v47 }
 0x9ca   :  { %v1832_v53 = vpop.f32.mrb[41].mxu0  ;;  %3164 = vmatmul.mubr.msk.f32.gmra.mrb[30].mxu1 %vm231_vm2, %v1854_v48  ;;  %v1856_v63 = vmul.f32 %v3152_v52, %v3785_v17  ;;  %v3304_v17 = vpack.c.bf16 %v2139_v31, %v2138_v56 }
 0x9cb   :  { %v1855_v61 = vmul.f32 %v1832_v53, %v3783_v13  ;;  %v3300_v13 = vpack.c.bf16 %v2137_v28, %v2136_v19 }
 0x9cd   :  { %v3155_v23 = vpop.f32.mrb[42].mxu0  ;;  %3166 = vmatprep.mubr.msk.f32.mxu1 %vm231_vm2, %v1855_v61  ;;  %3301 = vmatprep.subr.bf16.mxu1 %v3300_v13  ;;  %v2435_v61 = vld [vmem:[#allocation2 + $0xe0] sm:$0xff] }
 0x9ce   :  { %v1842_v54 = vpop.f32.mrb[43].mxu0  ;;  %3167 = vmatmul.mubr.msk.f32.gmra.mrb[32].mxu1 %vm231_vm2, %v1856_v63  ;;  %v1858_v7 = vmul.f32 %v3155_v23, %v3793_v26  ;;  %v2437_v23 = vld [vmem:[#allocation2 + $0xf0] sm:$0xff] }
 0x9cf   :  { %v1857_v5 = vmul.f32 %v1842_v54, %v3791_v25  ;;  %3303 = vmatpush3.bf16.msra.mxu1 %v3300_v13  ;;  %v2438_v54 = vld [vmem:[#allocation2 + $0xf8] sm:$0xff] }
 0x9d0   :  { %3305 = vmatprep.subr.bf16.mxu1 %v3304_v17 }
 0x9d1   :  { %3169 = vmatprep.mubr.msk.f32.mxu1 %vm231_vm2, %v1857_v5  ;;  %v2439_v5 = vld [vmem:[#allocation2 + $0x100] sm:$0xff] }
 0x9d2   :  { %3170 = vmatmul.mubr.msk.f32.gmra.mrb[34].mxu1 %vm231_vm2, %v1858_v7  ;;  %vm2149_vm2 = vcmask 523264  }
 0x9d3   :  { %3307 = vmatpush3.bf16.msra.mxu1 %v3304_v17 }
 0x9d4   :  { %3309 = vmatprep.subr.bf16.mxu1 %v3308_v58 }
 0x9d7   :  { %3311 = vmatpush3.bf16.msra.mxu1 %v3308_v58 }
 0x9d8   :  { %3313 = vmatprep.subr.bf16.mxu1 %v3312_v16 }
 0x9db   :  { %3315 = vmatpush3.bf16.msra.mxu1 %v3312_v16 }
 0x9dc   :  { %3234 = vmatprep.subr.msk.mxu1 %vm67_vm0, %v2442_v0 }
 0xa96   :  { %v3162_v25 = vpop.f32.mrb[28].mxu1 }
 0xa97   :  { %v1951_v26 = vpop.f32.mrb[29].mxu1 }
 0xa98   :  { %3174 = vmatprep.mubr.msk.f32.mxu0 %vm42_vm1, %v1951_v26 }
 0xa99   :  { %3175 = vmatmul.mubr.msk.f32.vlgmr.msra.gmra.mrb[44].mxu0 %vm42_vm1, %v3162_v25 }
 0xa9a   :  { %3319 = vmatpush3.bf16.msra.mxu0 %v3316_v37  ;;  %v2441_v37 = vld [vmem:[#allocation2 + $0x110] sm:$0xff] }
 0xa9d   :  { %v3165_v34 = vpop.f32.mrb[30].mxu1 }
 0xa9e   :  { %v1961_v12 = vpop.f32.mrb[31].mxu1 }
 0xa9f   :  { %3177 = vmatprep.mubr.msk.f32.mxu0 %vm42_vm1, %v1961_v12 }
 0xaa0   :  { %3178 = vmatmul.mubr.msk.f32.gmra.mrb[46].mxu0 %vm42_vm1, %v3165_v34 }
 0xaa1   :  { %v3168_v59 = vpop.f32.mrb[32].mxu1 }
 0xaa2   :  { %v1971_v1 = vpop.f32.mrb[33].mxu1 }
 0xaa3   :  { %3180 = vmatprep.mubr.msk.f32.mxu0 %vm42_vm1, %v1971_v1 }
 0xaa4   :  { %3181 = vmatmul.mubr.msk.f32.gmra.mrb[48].mxu0 %vm42_vm1, %v3168_v59 }
 0xaa5   :  { %v3171_v2 = vpop.f32.mrb[34].mxu1 }
 0xaa6   :  { %v1981_v39 = vpop.f32.mrb[35].mxu1 }
 0xaa7   :  { %3183 = vmatprep.mubr.msk.f32.mxu0 %vm42_vm1, %v1981_v39 }
 0xaa8   :  { %3184 = vmatmul.mubr.msk.f32.gmra.mrb[50].mxu0 %vm42_vm1, %v3171_v2 }
 0xb6c   :  { %v3176_v49 = vpop.f32.mrb[44].mxu0 }
 0xb6d   :  { %v2095_v38 = vadd.f32 %v3176_v49, %v2816_v50  ;;  %v2089_v8 = vpop.f32.mrb[45].mxu0  ;;  %v2835_v49 = vld [vmem:[%s4086_s2 + $0xc] ss:$0 sm:$0xff] }
 0xb6e   :  { %v2090_v43 = vadd.f32 %v2816_v50, %v2089_v8 }
 0xb6f   :  { %v2129_v9 = vmax.f32 %v2095_v38, 0.0 }
 0xb70   :  { %v2128_v20 = vmax.f32 %v2090_v43, 0.0 }
 0xb72   :  { %3202 = vmatprep.mubr.msk.f32.mxu1 %vm2149_vm2, %v2128_v20 }
 0xb73   :  { %v3179_v10 = vpop.f32.mrb[46].mxu0  ;;  %3203 = vmatmul.mubr.msk.f32.vlgmr.msra.gmra.mrb[36].mxu1 %vm2149_vm2, %v2129_v9 }
 0xb74   :  { %v2105_v41 = vadd.f32 %v3179_v10, %v2816_v50  ;;  %v2099_v14 = vpop.f32.mrb[47].mxu0  ;;  %3235 = vmatpush3.msk.msra.mxu1 %vm67_vm0, %v2442_v0  ;;  %vm2296_vm0 = vcmask 261120  }
 0xb75   :  { %v2100_v60 = vadd.f32 %v2816_v50, %v2099_v14 }
 0xb76   :  { %v2131_v27 = vmax.f32 %v2105_v41, 0.0 }
 0xb77   :  { %v2130_v21 = vmax.f32 %v2100_v60, 0.0  ;;  %v3182_v62 = vpop.f32.mrb[48].mxu0 }
 0xb78   :  { %v2115_v29 = vadd.f32 %v3182_v62, %v2816_v50  ;;  %v2109_v33 = vpop.f32.mrb[49].mxu0 }
 0xb79   :  { %v2110_v11 = vadd.f32 %v2816_v50, %v2109_v33  ;;  %3205 = vmatprep.mubr.msk.f32.mxu1 %vm2149_vm2, %v2130_v21 }
 0xb7a   :  { %3206 = vmatmul.mubr.msk.f32.gmra.mrb[38].mxu1 %vm2149_vm2, %v2131_v27  ;;  %v2133_v42 = vmax.f32 %v2115_v29, 0.0 }
 0xb7b   :  { %v2132_v36 = vmax.f32 %v2110_v11, 0.0  ;;  %v3185_v15 = vpop.f32.mrb[50].mxu0 }
 0xb7c   :  { %v2125_v44 = vadd.f32 %v3185_v15, %v2816_v50  ;;  %v2119_v46 = vpop.f32.mrb[51].mxu0 }
 0xb7d   :  { %v2120_v47 = vadd.f32 %v2816_v50, %v2119_v46  ;;  %3208 = vmatprep.mubr.msk.f32.mxu1 %vm2149_vm2, %v2132_v36  ;;  %v3336_v50 = vpack.c.bf16 %v2441_v37, %v2440_v6 }
 0xb7e   :  { %3209 = vmatmul.mubr.msk.f32.gmra.mrb[40].mxu1 %vm2149_vm2, %v2133_v42  ;;  %v2135_v52 = vmax.f32 %v2125_v44, 0.0 }
 0xb7f   :  { %v2134_v48 = vmax.f32 %v2120_v47, 0.0 }
 0xb81   :  { %3211 = vmatprep.mubr.msk.f32.mxu1 %vm2149_vm2, %v2134_v48 }
 0xb82   :  { %3212 = vmatmul.mubr.msk.f32.gmra.mrb[42].mxu1 %vm2149_vm2, %v2135_v52 }
 0xb83   :  { %3236 = vmatprep.mubr.msk.f32.mxu1 %vm42_vm1, %v3948_v55  ;;  %v2289_v55 = vld [vmem:[#allocation2 + $0xc8] sm:$0xff] }
 0xb86   :  { %3237 = vmatmul.mubr.msk.f32.vlgmr.msra.gmra.mrb[44].mxu1 %vm42_vm1, %v3950_v40  ;;  %v2290_v40 = vld [vmem:[#allocation2 + $0xd0] sm:$0xff] }
 0xb87   :  { %3239 = vmatprep.mubr.msk.f32.mxu1 %vm42_vm1, %v3956_v18  ;;  %v3320_v53 = vpack.c.bf16 %v2290_v40, %v2289_v55  ;;  %v2434_v18 = vld [vmem:[#allocation2 + $0xd8] sm:$0xff]  ;;  %v2861_v40 = vld [vmem:[%s4086_s2 + $0xd] ss:$0 sm:$0xff] }
 0xb88   :  { %v3324_v63 = vpack.c.bf16 %v2435_v61, %v2434_v18 }
 0xb89   :  { %3321 = vmatprep.subr.bf16.mxu0 %v3320_v53 }
 0xb8a   :  { %3240 = vmatmul.mubr.msk.f32.gmra.mrb[46].mxu1 %vm42_vm1, %v3960_v24  ;;  %3323 = vmatpush3.bf16.msra.mxu0 %v3320_v53  ;;  %v2436_v24 = vld [vmem:[#allocation2 + $0xe8] sm:$0xff] }
 0xb8b   :  { %3242 = vmatprep.mubr.msk.f32.mxu1 %vm42_vm1, %v3962_v22  ;;  %v3328_v22 = vpack.c.bf16 %v2437_v23, %v2436_v24  ;;  %3325 = vmatprep.subr.bf16.mxu1 %v3324_v63 }
 0xb8c   :  { %3327 = vmatpush3.bf16.msra.mxu1 %v3324_v63 }
 0xb8d   :  { %3329 = vmatprep.subr.bf16.mxu1 %v3328_v22 }
 0xb8e   :  { %3243 = vmatmul.mubr.msk.f32.gmra.mrb[48].mxu1 %vm42_vm1, %v3968_v51  ;;  %v3332_v51 = vpack.c.bf16 %v2439_v5, %v2438_v54 }
 0xb8f   :  { %3245 = vmatprep.mubr.msk.f32.mxu1 %vm42_vm1, %v3972_v45  ;;  %v2826_v45 = vld [vmem:[%s4086_s2 + $0xb] ss:$0 sm:$0xff] }
 0xb90   :  { %3331 = vmatpush3.bf16.msra.mxu1 %v3328_v22 }
 0xb91   :  { %3333 = vmatprep.subr.bf16.mxu1 %v3332_v51 }
 0xb92   :  { %3246 = vmatmul.mubr.msk.f32.gmra.mrb[50].mxu1 %vm42_vm1, %v3974_v32 }
 0xb94   :  { %3335 = vmatpush3.bf16.msra.mxu1 %v3332_v51 }
 0xb95   :  { %3337 = vmatprep.subr.bf16.mxu1 %v3336_v50 }
 0xb98   :  { %3339 = vmatpush3.bf16.msra.mxu1 %v3336_v50 }
 0xc46   :  { %v3204_v32 = vpop.f32.mrb[36].mxu1 }
 0xc47   :  { %v2246_v7 = vadd.f32 %v3204_v32, %v2826_v45  ;;  %v2240_v19 = vpop.f32.mrb[37].mxu1 }
 0xc48   :  { %v2241_v28 = vadd.f32 %v2826_v45, %v2240_v19 }
 0xc49   :  { %v2280_v13 = vmax.f32 %v2246_v7, 0.0 }
 0xc4a   :  { %v2279_v56 = vmax.f32 %v2241_v28, 0.0 }
 0xc4c   :  { %3222 = vmatprep.mubr.msk.f32.mxu0 %vm2296_vm0, %v2279_v56 }
 0xc4d   :  { %v3207_v31 = vpop.f32.mrb[38].mxu1  ;;  %3223 = vmatmul.mubr.msk.f32.vlgmr.msra.gmra.mrb[52].mxu0 %vm2296_vm0, %v2280_v13 }
 0xc4e   :  { %v2256_v17 = vadd.f32 %v3207_v31, %v2826_v45  ;;  %v2250_v30 = vpop.f32.mrb[39].mxu1 }
 0xc4f   :  { %v2251_v57 = vadd.f32 %v2826_v45, %v2250_v30 }
 0xc50   :  { %v2282_v26 = vmax.f32 %v2256_v17, 0.0 }
 0xc51   :  { %v2281_v58 = vmax.f32 %v2251_v57, 0.0  ;;  %v3210_v25 = vpop.f32.mrb[40].mxu1 }
 0xc52   :  { %v2266_v34 = vadd.f32 %v3210_v25, %v2826_v45  ;;  %v2260_v12 = vpop.f32.mrb[41].mxu1 }
 0xc53   :  { %v2261_v59 = vadd.f32 %v2826_v45, %v2260_v12  ;;  %3225 = vmatprep.mubr.msk.f32.mxu0 %vm2296_vm0, %v2281_v58 }
 0xc54   :  { %3226 = vmatmul.mubr.msk.f32.gmra.mrb[54].mxu0 %vm2296_vm0, %v2282_v26  ;;  %v2284_v39 = vmax.f32 %v2266_v34, 0.0 }
 0xc55   :  { %v2283_v1 = vmax.f32 %v2261_v59, 0.0  ;;  %v3213_v2 = vpop.f32.mrb[42].mxu1 }
 0xc56   :  { %v2276_v4 = vadd.f32 %v3213_v2, %v2826_v45  ;;  %v2270_v35 = vpop.f32.mrb[43].mxu1 }
 0xc57   :  { %v2271_v16 = vadd.f32 %v2826_v45, %v2270_v35  ;;  %3228 = vmatprep.mubr.msk.f32.mxu0 %vm2296_vm0, %v2283_v1 }
 0xc58   :  { %3229 = vmatmul.mubr.msk.f32.gmra.mrb[56].mxu0 %vm2296_vm0, %v2284_v39  ;;  %v2286_v3 = vmax.f32 %v2276_v4, 0.0 }
 0xc59   :  { %v2285_v0 = vmax.f32 %v2271_v16, 0.0 }
 0xc5b   :  { %3231 = vmatprep.mubr.msk.f32.mxu0 %vm2296_vm0, %v2285_v0 }
 0xc5c   :  { %3232 = vmatmul.mubr.msk.f32.gmra.mrb[58].mxu0 %vm2296_vm0, %v2286_v3 }
 0xd20   :  { %v3224_v38 = vpop.f32.mrb[52].mxu0 }
 0xd21   :  { %v2393_v8 = vadd.f32 %v3224_v38, %v2835_v49  ;;  %v2387_v43 = vpop.f32.mrb[53].mxu0 }
 0xd22   :  { %v2388_v20 = vadd.f32 %v2835_v49, %v2387_v43 }
 0xd23   :  { %v2427_v10 = vmax.f32 %v2393_v8, 0.0 }
 0xd24   :  { %v2426_v9 = vmax.f32 %v2388_v20, 0.0 }
 0xd26   :  { %3264 = vmatprep.mubr.msk.f32.mxu1 %vm2149_vm2, %v2426_v9 }
 0xd27   :  { %v3227_v41 = vpop.f32.mrb[54].mxu0  ;;  %3265 = vmatmul.mubr.msk.f32.vlgmr.msra.gmra.mrb[44].mxu1 %vm2149_vm2, %v2427_v10 }
 0xd28   :  { %v2403_v14 = vadd.f32 %v3227_v41, %v2835_v49  ;;  %v2397_v60 = vpop.f32.mrb[55].mxu0 }
 0xd29   :  { %v2398_v21 = vadd.f32 %v2835_v49, %v2397_v60 }
 0xd2a   :  { %v2429_v29 = vmax.f32 %v2403_v14, 0.0 }
 0xd2b   :  { %v2428_v62 = vmax.f32 %v2398_v21, 0.0  ;;  %v3230_v27 = vpop.f32.mrb[56].mxu0 }
 0xd2c   :  { %v2413_v33 = vadd.f32 %v3230_v27, %v2835_v49  ;;  %v2407_v11 = vpop.f32.mrb[57].mxu0 }
 0xd2d   :  { %v2408_v36 = vadd.f32 %v2835_v49, %v2407_v11  ;;  %3267 = vmatprep.mubr.msk.f32.mxu1 %vm2149_vm2, %v2428_v62 }
 0xd2e   :  { %3268 = vmatmul.mubr.msk.f32.gmra.mrb[46].mxu1 %vm2149_vm2, %v2429_v29  ;;  %v2431_v44 = vmax.f32 %v2413_v33, 0.0 }
 0xd2f   :  { %v2430_v15 = vmax.f32 %v2408_v36, 0.0  ;;  %v3233_v42 = vpop.f32.mrb[58].mxu0 }
 0xd30   :  { %v2423_v46 = vadd.f32 %v3233_v42, %v2835_v49  ;;  %v2417_v47 = vpop.f32.mrb[59].mxu0 }
 0xd31   :  { %v2418_v48 = vadd.f32 %v2835_v49, %v2417_v47  ;;  %3270 = vmatprep.mubr.msk.f32.mxu1 %vm2149_vm2, %v2430_v15 }
 0xd32   :  { %3271 = vmatmul.mubr.msk.f32.gmra.mrb[48].mxu1 %vm2149_vm2, %v2431_v44  ;;  %v2433_v55 = vmax.f32 %v2423_v46, 0.0 }
 0xd33   :  { %v2432_v52 = vmax.f32 %v2418_v48, 0.0 }
 0xd35   :  { %3273 = vmatprep.mubr.msk.f32.mxu1 %vm2149_vm2, %v2432_v52 }
 0xd36   :  { %3274 = vmatmul.mubr.msk.f32.gmra.mrb[50].mxu1 %vm2149_vm2, %v2433_v55 }
 0xdfa   :  { %v3266_v53 = vpop.f32.mrb[44].mxu1 }
 0xdfb   :  { %v2686_v18 = vadd.f32 %v3266_v53, %v2861_v40  ;;  %v2641_v61 = vpop.f32.mrb[45].mxu1 }
 0xdfc   :  { %v2685_v24 = vadd.f32 %v2861_v40, %v2641_v61 }
 0xdfd   :  { %2694 = vst [vmem:[%s4087_s3 + $0x8] sm:$0xff] %v2686_v18 }
 0xdfe   :  { %2693 = vst [vmem:[%s4087_s3] sm:$0xff] %v2685_v24 }
 0xe01   :  { %v3269_v63 = vpop.f32.mrb[46].mxu1 }
 0xe02   :  { %v2688_v23 = vadd.f32 %v3269_v63, %v2861_v40  ;;  %v2651_v22 = vpop.f32.mrb[47].mxu1 }
 0xe03   :  { %v2687_v54 = vadd.f32 %v2861_v40, %v2651_v22 }
 0xe04   :  { %2696 = vst [vmem:[%s4087_s3 + $0x18] sm:$0xff] %v2688_v23 }
 0xe05   :  { %2695 = vst [vmem:[%s4087_s3 + $0x10] sm:$0xff] %v2687_v54  ;;  %v3272_v5 = vpop.f32.mrb[48].mxu1 }
 0xe06   :  { %v2690_v51 = vadd.f32 %v3272_v5, %v2861_v40  ;;  %v2661_v45 = vpop.f32.mrb[49].mxu1 }
 0xe07   :  { %v2689_v32 = vadd.f32 %v2861_v40, %v2661_v45 }
 0xe08   :  { %2698 = vst [vmem:[%s4087_s3 + $0x28] sm:$0xff] %v2690_v51 }
 0xe09   :  { %2697 = vst [vmem:[%s4087_s3 + $0x20] sm:$0xff] %v2689_v32  ;;  %v3275_v7 = vpop.f32.mrb[50].mxu1 }
 0xe0a   :  { %v2692_v19 = vadd.f32 %v3275_v7, %v2861_v40  ;;  %v2671_v28 = vpop.f32.mrb[51].mxu1 }
 0xe0b   :  { %v2691_v56 = vadd.f32 %v2861_v40, %v2671_v28 }
 0xe0c   :  { %2700 = vst [vmem:[%s4087_s3 + $0x38] sm:$0xff] %v2692_v19 }
 0xe0d   :  { %2699 = vst [vmem:[%s4087_s3 + $0x30] sm:$0xff] %v2691_v56 }
 0xe0e   :  { %2705 = vsyncpa [#allocation3], 1 }

</bundles_post_ra>
